<compile_context>
chip_gen: v6e
topology: v6e:2x2x1
jax: 0.10.0
libtpu: 0.0.40
codegen_flags: <defaults>
</compile_context>

<pallas_src>
import functools

import jax
import jax.numpy as jnp
import numpy as np
from jax import lax
from jax.experimental import pallas as pl
from jax.experimental.pallas import tpu as pltpu


def flowhead_kernel(x_ref, w1_ref, b1_ref, w2t_ref, b2_ref, out_ref, hp_ref,
                    *, out_w, band_rows):
    # x_ref  : (1, H+4, WP, Cin)  bf16 zero-padded input (whole image, one n)
    # w1_ref : (3, 3*Cin, Hid)    bf16 conv1 weights grouped by dx, rows (dy, ci)
    # b1_ref : (1, Hid)           f32 conv1 bias
    # w2t_ref: (3, 2, 3*Hid)      bf16 conv2 weights grouped by dx, cols (dy, hid)
    # b2_ref : (2, 1)             f32 conv2 bias
    # out_ref: (1, 2, BH*W)       f32 lane-dense output band
    # hp_ref : VMEM (BH+2, WP, Hid) bf16 padded hidden band (1-row halo each side)
    W = out_w
    BH = band_rows
    Cin = x_ref.shape[3]
    Hid = hp_ref.shape[2]

    b = pl.program_id(1)
    nb = pl.num_programs(1)
    row0 = b * BH                      # first padded-x row this band touches
    if BH % 8 == 0:
        row0 = pl.multiple_of(row0, 8)

    # ---- conv1: 3 accumulating MXU matmuls (one per dx, K = 3*Cin) ----------
    # Per dx: one slab read (only dx=1,2 are sublane-misaligned), dy shifts are
    # leading-dim slices of the loaded value, concat along channels -> K=3*Cin.
    acc1 = None
    for dx in range(3):
        slab = x_ref[0, pl.ds(row0, BH + 4), dx:dx + W, :]        # (BH+4, W, Cin)
        patch = jnp.concatenate([slab[dy:dy + BH + 2] for dy in range(3)],
                                axis=-1)                          # (BH+2, W, 3Cin)
        patch = patch.reshape((BH + 2) * W, 3 * Cin)
        part = jnp.dot(patch, w1_ref[dx],
                       preferred_element_type=jnp.float32)        # f32 acc
        acc1 = part if acc1 is None else acc1 + part

    # Bias + ReLU in f32, single cast to bf16 on the store into the hidden slab.
    h = jnp.maximum(acc1 + b1_ref[...], 0.0)
    hp_ref[:, 1:W + 1, :] = h.reshape(BH + 2, W, Hid).astype(hp_ref.dtype)

    # Zero-pad columns of the hidden slab (1-col strips only).
    hp_ref[:, 0:1, :] = jnp.zeros((BH + 2, 1, Hid), hp_ref.dtype)
    hp_ref[:, W + 1:W + 2, :] = jnp.zeros((BH + 2, 1, Hid), hp_ref.dtype)

    # Out-of-image halo rows of h must be zero (conv2 zero-padding semantics).
    @pl.when(b == 0)
    def _():
        hp_ref[0:1, :, :] = jnp.zeros((1, hp_ref.shape[1], Hid), hp_ref.dtype)

    @pl.when(b == nb - 1)
    def _():
        hp_ref[BH + 1:BH + 2, :, :] = jnp.zeros((1, hp_ref.shape[1], Hid),
                                                hp_ref.dtype)

    # ---- conv2: 3 accumulating matmuls, trans_b form -> lane-dense (2, BH*W) --
    acc2 = None
    for dx in range(3):
        slab = hp_ref[:, dx:dx + W, :]                            # (BH+2, W, Hid)
        patch = jnp.concatenate([slab[dy:dy + BH] for dy in range(3)],
                                axis=-1)                          # (BH, W, 3*Hid)
        patch = patch.reshape(BH * W, 3 * Hid)
        part = lax.dot_general(w2t_ref[dx], patch,
                               dimension_numbers=(((1,), (1,)), ((), ())),
                               preferred_element_type=jnp.float32)  # (2, BH*W)
        acc2 = part if acc2 is None else acc2 + part

    out_ref[0] = acc2 + b2_ref[...]


def flow_head(x_nchw, w1, b1, w2, b2, band_rows=None):
    """x_nchw: (N, Cin, H, W) f32. w1/w2 in HWIO. Returns (N, 2, H, W) f32."""
    N, Cin, H, W = x_nchw.shape
    Hid = w1.shape[3]

    # Row-band size: largest "nice" divisor of H (halo recompute is 2 rows/band).
    if band_rows is None:
        band_rows = H
        for cand in (48, 40, 32, 24, 16, 8):
            if cand <= H and H % cand == 0:
                band_rows = cand
                break
    BH = band_rows
    assert H % BH == 0, (H, BH)
    NB = H // BH
    WP = ((W + 2 + 7) // 8) * 8        # padded width rounded up to sublane tile

    # Channels-last, bf16 for the MXU; zero padding done once here (2 rows
    # top/bottom for the hidden-halo recompute, 1 col left, >=1 col right).
    x_nhwc = jnp.transpose(x_nchw, (0, 2, 3, 1)).astype(jnp.bfloat16)
    x_pad = jnp.pad(x_nhwc, ((0, 0), (2, 2), (1, WP - W - 1), (0, 0)))

    # Weights grouped by dx tap; inner row/col order is (dy, channel).
    w1_by_dx = jnp.transpose(w1.astype(jnp.bfloat16),
                             (1, 0, 2, 3)).reshape(3, 3 * Cin, Hid)
    w2_by_dx = jnp.transpose(w2.astype(jnp.bfloat16),
                             (1, 0, 2, 3)).reshape(3, 3 * Hid, 2)
    w2t_by_dx = jnp.transpose(w2_by_dx, (0, 2, 1))                # (3, 2, 3*Hid)
    b1_row = b1.reshape(1, Hid).astype(jnp.float32)
    b2_col = b2.reshape(2, 1).astype(jnp.float32)

    # Per-band VMEM working-set estimate -> explicit scoped-VMEM limit
    # (clamped so it is legal on v5e/v6e/v7x; v7x physical VMEM is 64 MiB).
    est = 0
    est += 2 * (H + 4) * WP * Cin * 2                 # x block (double-buffered)
    est += 2 * (w1_by_dx.size + w2t_by_dx.size) * 2   # weights
    est += 2 * (b1_row.size + b2_col.size) * 4        # biases
    est += 2 * 2 * BH * W * 4                         # output block
    est += (BH + 2) * WP * Hid * 2                    # hidden scratch
    est += (BH + 4) * W * Cin * 2                     # conv1 slab
    est += (BH + 2) * W * 3 * Cin * 2                 # conv1 patch
    est += 3 * (BH + 2) * W * Hid * 4                 # conv1 f32 acc / h
    est += BH * W * 3 * Hid * 2                       # conv2 patch
    est += 4 * BH * W * 4                             # conv2 f32 acc
    vmem_limit = int(min(max(2 * est, 32 * 1024 * 1024), 48 * 1024 * 1024))

    cost = pl.CostEstimate(
        flops=2 * N * H * W * 9 * (Cin * Hid + Hid * 2),
        transcendentals=0,
        bytes_accessed=int(x_pad.size * 2 + N * 2 * H * W * 4
                           + w1_by_dx.size * 2 + w2t_by_dx.size * 2
                           + b1_row.size * 4 + b2_col.size * 4))

    kernel = functools.partial(flowhead_kernel, out_w=W, band_rows=BH)

    out_flat = pl.pallas_call(
        kernel,
        out_shape=jax.ShapeDtypeStruct((N, 2, H * W), jnp.float32),
        grid_spec=pltpu.PrefetchScalarGridSpec(
            num_scalar_prefetch=0,
            grid=(N, NB),
            in_specs=[
                # Full padded image per batch element; block index does not
                # change across the band axis, so it is fetched once per n.
                pl.BlockSpec((1, H + 4, WP, Cin), lambda n, b: (n, 0, 0, 0)),
                pl.BlockSpec((3, 3 * Cin, Hid), lambda n, b: (0, 0, 0)),
                pl.BlockSpec((1, Hid), lambda n, b: (0, 0)),
                pl.BlockSpec((3, 2, 3 * Hid), lambda n, b: (0, 0, 0)),
                pl.BlockSpec((2, 1), lambda n, b: (0, 0)),
            ],
            out_specs=pl.BlockSpec((1, 2, BH * W), lambda n, b: (n, 0, b)),
            scratch_shapes=[
                pltpu.VMEM((BH + 2, WP, Hid), jnp.bfloat16),
            ],
        ),
        compiler_params=pltpu.CompilerParams(
            dimension_semantics=("parallel", "parallel"),
            vmem_limit_bytes=vmem_limit),
        cost_estimate=cost,
    )(x_pad, w1_by_dx, b1_row, w2t_by_dx, b2_col)

    # Free trailing-dim split: (N, 2, H*W) -> (N, 2, H, W) (NCHW, as PyTorch).
    return out_flat.reshape(N, 2, H, W)


def _reference(x_nchw, w1, b1, w2, b2):
    """Pure-JAX f32 reference using lax.conv (NHWC / HWIO)."""
    x = jnp.transpose(x_nchw, (0, 2, 3, 1))
    dn = ('NHWC', 'HWIO', 'NHWC')
    h = lax.conv_general_dilated(x, w1, (1, 1), 'SAME', dimension_numbers=dn)
    h = jax.nn.relu(h + b1.reshape(1, 1, 1, -1))
    o = lax.conv_general_dilated(h, w2, (1, 1), 'SAME', dimension_numbers=dn)
    o = o + b2.reshape(1, 1, 1, -1)
    return jnp.transpose(o, (0, 3, 1, 2))


if __name__ == "__main__":
    # Small shapes consistent with FlowHead(input_dim, hidden_dim) on a
    # (N, input_dim, H, W) feature map.  band_rows=8 -> 3 bands, so the
    # first / middle / last band (halo + boundary-zeroing) paths all run.
    N, Cin, Hid, H, W = 2, 16, 32, 24, 16

    key = jax.random.PRNGKey(0)
    kx, k1, kb1, k2, kb2 = jax.random.split(key, 5)

    x = jax.random.normal(kx, (N, Cin, H, W), jnp.float32)
    w1 = jax.random.normal(k1, (3, 3, Cin, Hid), jnp.float32) * 0.05
    b1 = jax.random.normal(kb1, (1, Hid), jnp.float32) * 0.05
    w2 = jax.random.normal(k2, (3, 3, Hid, 2), jnp.float32) * 0.05
    b2 = jax.random.normal(kb2, (1, 2), jnp.float32) * 0.05

    out = flow_head(x, w1, b1, w2, b2, band_rows=8)
    out = jax.block_until_ready(out)

    ref = jax.block_until_ready(_reference(x, w1, b1, w2, b2))
    assert out.shape == (N, 2, H, W), out.shape
    # bf16 MXU operands (f32 accumulation) -> looser tolerance than pure f32.
    np.testing.assert_allclose(np.asarray(out), np.asarray(ref),
                               rtol=2e-2, atol=2e-2)

    print("KERNEL_OK")
</pallas_src>

<mosaic_0001>
module attributes {stable_mosaic.version = 11 : i64} {
  func.func @flowhead_kernel(%arg0: i32, %arg1: i32, %arg2: memref<1x28x24x16xbf16, #tpu.memory_space<vmem>>, %arg3: memref<3x48x32xbf16, #tpu.memory_space<vmem>>, %arg4: memref<1x32xf32, #tpu.memory_space<vmem>>, %arg5: memref<3x2x96xbf16, #tpu.memory_space<vmem>>, %arg6: memref<2x1xf32, #tpu.memory_space<vmem>>, %arg7: memref<1x2x128xf32, #tpu.memory_space<vmem>>, %arg8: memref<10x24x32xbf16, #tpu.memory_space<vmem>>) attributes {dimension_semantics = [#tpu.dimension_semantics<parallel>, #tpu.dimension_semantics<parallel>], iteration_bounds = array<i64: 2, 3>, scalar_prefetch = 0 : i64, scratch_operands = 1 : i64, tpu.core_type = #tpu.core_type<tc>, window_params = [{transform_indices = @transform_0, window_bounds = array<i64: 1, 28, 24, 16>}, {pipeline_mode = #tpu.pipeline_mode<synchronous>, transform_indices = @transform_1, window_bounds = array<i64: 3, 48, 32>}, {pipeline_mode = #tpu.pipeline_mode<synchronous>, transform_indices = @transform_2, window_bounds = array<i64: 1, 32>}, {pipeline_mode = #tpu.pipeline_mode<synchronous>, transform_indices = @transform_3, window_bounds = array<i64: 3, 2, 96>}, {pipeline_mode = #tpu.pipeline_mode<synchronous>, transform_indices = @transform_4, window_bounds = array<i64: 2, 1>}, {transform_indices = @transform_5, window_bounds = array<i64: 1, 2, 128>}]} {
    %c8_i32 = arith.constant 8 : i32
    %0 = arith.muli %arg1, %c8_i32 : i32
    %1 = tpu.assume_multiple %0, 8 : i32
    %c0 = arith.constant 0 : index
    %2 = arith.index_cast %1 : i32 to index
    %c0_0 = arith.constant 0 : index
    %c0_1 = arith.constant 0 : index
    %3 = vector.load %arg2[%c0, %2, %c0_0, %c0_1] : memref<1x28x24x16xbf16, #tpu.memory_space<vmem>>, vector<1x12x16x16xbf16>
    %4 = vector.shape_cast %3 : vector<1x12x16x16xbf16> to vector<12x16x16xbf16>
    %5 = vector.extract_strided_slice %4 {offsets = [0, 0, 0], sizes = [10, 16, 16], strides = [1, 1, 1]} : vector<12x16x16xbf16> to vector<10x16x16xbf16>
    %6 = vector.extract_strided_slice %4 {offsets = [1, 0, 0], sizes = [10, 16, 16], strides = [1, 1, 1]} : vector<12x16x16xbf16> to vector<10x16x16xbf16>
    %7 = vector.extract_strided_slice %4 {offsets = [2, 0, 0], sizes = [10, 16, 16], strides = [1, 1, 1]} : vector<12x16x16xbf16> to vector<10x16x16xbf16>
    %8 = tpu.concatenate %5, %6, %7 in 2 : vector<10x16x16xbf16>, vector<10x16x16xbf16>, vector<10x16x16xbf16> -> vector<10x16x48xbf16>
    %9 = vector.shape_cast %8 : vector<10x16x48xbf16> to vector<160x48xbf16>
    %c0_2 = arith.constant 0 : index
    %c0_3 = arith.constant 0 : index
    %c0_4 = arith.constant 0 : index
    %10 = vector.load %arg3[%c0_2, %c0_3, %c0_4] : memref<3x48x32xbf16, #tpu.memory_space<vmem>>, vector<1x48x32xbf16>
    %11 = vector.shape_cast %10 : vector<1x48x32xbf16> to vector<48x32xbf16>
    %cst = arith.constant dense<0.000000e+00> : vector<160x32xf32>
    %12 = tpu.matmul %9, %11, %cst {dimension_numbers = #tpu.dot_dimension_numbers<[1], [0], [0], [1], [0, 0, 1, 1], [], []>} : vector<160x48xbf16>, vector<48x32xbf16>, vector<160x32xf32> -> vector<160x32xf32>
    %c0_5 = arith.constant 0 : index
    %13 = arith.index_cast %1 : i32 to index
    %c1 = arith.constant 1 : index
    %c0_6 = arith.constant 0 : index
    %14 = vector.load %arg2[%c0_5, %13, %c1, %c0_6] : memref<1x28x24x16xbf16, #tpu.memory_space<vmem>>, vector<1x12x16x16xbf16>
    %15 = vector.shape_cast %14 : vector<1x12x16x16xbf16> to vector<12x16x16xbf16>
    %16 = vector.extract_strided_slice %15 {offsets = [0, 0, 0], sizes = [10, 16, 16], strides = [1, 1, 1]} : vector<12x16x16xbf16> to vector<10x16x16xbf16>
    %17 = vector.extract_strided_slice %15 {offsets = [1, 0, 0], sizes = [10, 16, 16], strides = [1, 1, 1]} : vector<12x16x16xbf16> to vector<10x16x16xbf16>
    %18 = vector.extract_strided_slice %15 {offsets = [2, 0, 0], sizes = [10, 16, 16], strides = [1, 1, 1]} : vector<12x16x16xbf16> to vector<10x16x16xbf16>
    %19 = tpu.concatenate %16, %17, %18 in 2 : vector<10x16x16xbf16>, vector<10x16x16xbf16>, vector<10x16x16xbf16> -> vector<10x16x48xbf16>
    %20 = vector.shape_cast %19 : vector<10x16x48xbf16> to vector<160x48xbf16>
    %c1_7 = arith.constant 1 : index
    %c0_8 = arith.constant 0 : index
    %c0_9 = arith.constant 0 : index
    %21 = vector.load %arg3[%c1_7, %c0_8, %c0_9] : memref<3x48x32xbf16, #tpu.memory_space<vmem>>, vector<1x48x32xbf16>
    %22 = vector.shape_cast %21 : vector<1x48x32xbf16> to vector<48x32xbf16>
    %cst_10 = arith.constant dense<0.000000e+00> : vector<160x32xf32>
    %23 = tpu.matmul %20, %22, %cst_10 {dimension_numbers = #tpu.dot_dimension_numbers<[1], [0], [0], [1], [0, 0, 1, 1], [], []>} : vector<160x48xbf16>, vector<48x32xbf16>, vector<160x32xf32> -> vector<160x32xf32>
    %24 = arith.addf %12, %23 : vector<160x32xf32>
    %c0_11 = arith.constant 0 : index
    %25 = arith.index_cast %1 : i32 to index
    %c2 = arith.constant 2 : index
    %c0_12 = arith.constant 0 : index
    %26 = vector.load %arg2[%c0_11, %25, %c2, %c0_12] : memref<1x28x24x16xbf16, #tpu.memory_space<vmem>>, vector<1x12x16x16xbf16>
    %27 = vector.shape_cast %26 : vector<1x12x16x16xbf16> to vector<12x16x16xbf16>
    %28 = vector.extract_strided_slice %27 {offsets = [0, 0, 0], sizes = [10, 16, 16], strides = [1, 1, 1]} : vector<12x16x16xbf16> to vector<10x16x16xbf16>
    %29 = vector.extract_strided_slice %27 {offsets = [1, 0, 0], sizes = [10, 16, 16], strides = [1, 1, 1]} : vector<12x16x16xbf16> to vector<10x16x16xbf16>
    %30 = vector.extract_strided_slice %27 {offsets = [2, 0, 0], sizes = [10, 16, 16], strides = [1, 1, 1]} : vector<12x16x16xbf16> to vector<10x16x16xbf16>
    %31 = tpu.concatenate %28, %29, %30 in 2 : vector<10x16x16xbf16>, vector<10x16x16xbf16>, vector<10x16x16xbf16> -> vector<10x16x48xbf16>
    %32 = vector.shape_cast %31 : vector<10x16x48xbf16> to vector<160x48xbf16>
    %c2_13 = arith.constant 2 : index
    %c0_14 = arith.constant 0 : index
    %c0_15 = arith.constant 0 : index
    %33 = vector.load %arg3[%c2_13, %c0_14, %c0_15] : memref<3x48x32xbf16, #tpu.memory_space<vmem>>, vector<1x48x32xbf16>
    %34 = vector.shape_cast %33 : vector<1x48x32xbf16> to vector<48x32xbf16>
    %cst_16 = arith.constant dense<0.000000e+00> : vector<160x32xf32>
    %35 = tpu.matmul %32, %34, %cst_16 {dimension_numbers = #tpu.dot_dimension_numbers<[1], [0], [0], [1], [0, 0, 1, 1], [], []>} : vector<160x48xbf16>, vector<48x32xbf16>, vector<160x32xf32> -> vector<160x32xf32>
    %36 = arith.addf %24, %35 : vector<160x32xf32>
    %c0_17 = arith.constant 0 : index
    %c0_18 = arith.constant 0 : index
    %37 = vector.load %arg4[%c0_17, %c0_18] : memref<1x32xf32, #tpu.memory_space<vmem>>, vector<1x32xf32>
    %38 = vector.broadcast %37 : vector<1x32xf32> to vector<160x32xf32>
    %39 = arith.addf %36, %38 : vector<160x32xf32>
    %cst_19 = arith.constant 0.000000e+00 : f32
    %40 = vector.broadcast %cst_19 : f32 to vector<160x32xf32>
    %41 = arith.maximumf %39, %40 : vector<160x32xf32>
    %42 = vector.shape_cast %41 : vector<160x32xf32> to vector<10x16x32xf32>
    %43 = arith.truncf %42 : vector<10x16x32xf32> to vector<10x16x32xbf16>
    %c0_20 = arith.constant 0 : index
    %c1_21 = arith.constant 1 : index
    %c0_22 = arith.constant 0 : index
    %44 = vector.load %arg8[%c0_20, %c1_21, %c0_22] : memref<10x24x32xbf16, #tpu.memory_space<vmem>>, vector<10x16x32xbf16>
    tpu.vector_store %arg8[%c0_20, %c1_21, %c0_22], %43 {strides = array<i32>} : memref<10x24x32xbf16, #tpu.memory_space<vmem>>, vector<10x16x32xbf16>,
    %cst_23 = arith.constant 0.000000e+00 : bf16
    %45 = vector.broadcast %cst_23 : bf16 to vector<10x1x32xbf16>
    %c0_24 = arith.constant 0 : index
    %c0_25 = arith.constant 0 : index
    %c0_26 = arith.constant 0 : index
    %46 = vector.load %arg8[%c0_24, %c0_25, %c0_26] : memref<10x24x32xbf16, #tpu.memory_space<vmem>>, vector<10x1x32xbf16>
    tpu.vector_store %arg8[%c0_24, %c0_25, %c0_26], %45 {strides = array<i32>} : memref<10x24x32xbf16, #tpu.memory_space<vmem>>, vector<10x1x32xbf16>,
    %cst_27 = arith.constant 0.000000e+00 : bf16
    %47 = vector.broadcast %cst_27 : bf16 to vector<10x1x32xbf16>
    %c0_28 = arith.constant 0 : index
    %c17 = arith.constant 17 : index
    %c0_29 = arith.constant 0 : index
    %48 = vector.load %arg8[%c0_28, %c17, %c0_29] : memref<10x24x32xbf16, #tpu.memory_space<vmem>>, vector<10x1x32xbf16>
    tpu.vector_store %arg8[%c0_28, %c17, %c0_29], %47 {strides = array<i32>} : memref<10x24x32xbf16, #tpu.memory_space<vmem>>, vector<10x1x32xbf16>,
    %c0_i32 = arith.constant 0 : i32
    %49 = arith.cmpi eq, %arg1, %c0_i32 : i32
    %50 = arith.extui %49 : i1 to i32
    %c0_i32_30 = arith.constant 0 : i32
    %51 = arith.cmpi ne, %50, %c0_i32_30 : i32
    scf.if %51 {
      %cst_58 = arith.constant 0.000000e+00 : bf16
      %90 = vector.broadcast %cst_58 : bf16 to vector<1x24x32xbf16>
      %c0_59 = arith.constant 0 : index
      %c0_60 = arith.constant 0 : index
      %c0_61 = arith.constant 0 : index
      %91 = vector.load %arg8[%c0_59, %c0_60, %c0_61] : memref<10x24x32xbf16, #tpu.memory_space<vmem>>, vector<1x24x32xbf16>
      tpu.vector_store %arg8[%c0_59, %c0_60, %c0_61], %90 {strides = array<i32>} : memref<10x24x32xbf16, #tpu.memory_space<vmem>>, vector<1x24x32xbf16>,
    } else {
    }
    %c2_i32 = arith.constant 2 : i32
    %52 = arith.cmpi eq, %arg1, %c2_i32 : i32
    %53 = arith.extui %52 : i1 to i32
    %c0_i32_31 = arith.constant 0 : i32
    %54 = arith.cmpi ne, %53, %c0_i32_31 : i32
    scf.if %54 {
      %cst_58 = arith.constant 0.000000e+00 : bf16
      %90 = vector.broadcast %cst_58 : bf16 to vector<1x24x32xbf16>
      %c9 = arith.constant 9 : index
      %c0_59 = arith.constant 0 : index
      %c0_60 = arith.constant 0 : index
      %91 = vector.load %arg8[%c9, %c0_59, %c0_60] : memref<10x24x32xbf16, #tpu.memory_space<vmem>>, vector<1x24x32xbf16>
      tpu.vector_store %arg8[%c9, %c0_59, %c0_60], %90 {strides = array<i32>} : memref<10x24x32xbf16, #tpu.memory_space<vmem>>, vector<1x24x32xbf16>,
    } else {
    }
    %c0_32 = arith.constant 0 : index
    %c0_33 = arith.constant 0 : index
    %c0_34 = arith.constant 0 : index
    %55 = vector.load %arg8[%c0_32, %c0_33, %c0_34] : memref<10x24x32xbf16, #tpu.memory_space<vmem>>, vector<10x16x32xbf16>
    %56 = vector.extract_strided_slice %55 {offsets = [0, 0, 0], sizes = [8, 16, 32], strides = [1, 1, 1]} : vector<10x16x32xbf16> to vector<8x16x32xbf16>
    %57 = vector.extract_strided_slice %55 {offsets = [1, 0, 0], sizes = [8, 16, 32], strides = [1, 1, 1]} : vector<10x16x32xbf16> to vector<8x16x32xbf16>
    %58 = vector.extract_strided_slice %55 {offsets = [2, 0, 0], sizes = [8, 16, 32], strides = [1, 1, 1]} : vector<10x16x32xbf16> to vector<8x16x32xbf16>
    %59 = tpu.concatenate %56, %57, %58 in 2 : vector<8x16x32xbf16>, vector<8x16x32xbf16>, vector<8x16x32xbf16> -> vector<8x16x96xbf16>
    %60 = vector.shape_cast %59 : vector<8x16x96xbf16> to vector<128x96xbf16>
    %c0_35 = arith.constant 0 : index
    %c0_36 = arith.constant 0 : index
    %c0_37 = arith.constant 0 : index
    %61 = vector.load %arg5[%c0_35, %c0_36, %c0_37] : memref<3x2x96xbf16, #tpu.memory_space<vmem>>, vector<1x2x96xbf16>
    %62 = vector.shape_cast %61 : vector<1x2x96xbf16> to vector<2x96xbf16>
    %cst_38 = arith.constant dense<0.000000e+00> : vector<2x128xf32>
    %63 = tpu.matmul %62, %60, %cst_38 {dimension_numbers = #tpu.dot_dimension_numbers<[1], [1], [0], [0], [0, 0, 1, 0], [], []>} : vector<2x96xbf16>, vector<128x96xbf16>, vector<2x128xf32> -> vector<2x128xf32>
    %c0_39 = arith.constant 0 : index
    %c1_40 = arith.constant 1 : index
    %c0_41 = arith.constant 0 : index
    %64 = vector.load %arg8[%c0_39, %c1_40, %c0_41] : memref<10x24x32xbf16, #tpu.memory_space<vmem>>, vector<10x16x32xbf16>
    %65 = vector.extract_strided_slice %64 {offsets = [0, 0, 0], sizes = [8, 16, 32], strides = [1, 1, 1]} : vector<10x16x32xbf16> to vector<8x16x32xbf16>
    %66 = vector.extract_strided_slice %64 {offsets = [1, 0, 0], sizes = [8, 16, 32], strides = [1, 1, 1]} : vector<10x16x32xbf16> to vector<8x16x32xbf16>
    %67 = vector.extract_strided_slice %64 {offsets = [2, 0, 0], sizes = [8, 16, 32], strides = [1, 1, 1]} : vector<10x16x32xbf16> to vector<8x16x32xbf16>
    %68 = tpu.concatenate %65, %66, %67 in 2 : vector<8x16x32xbf16>, vector<8x16x32xbf16>, vector<8x16x32xbf16> -> vector<8x16x96xbf16>
    %69 = vector.shape_cast %68 : vector<8x16x96xbf16> to vector<128x96xbf16>
    %c1_42 = arith.constant 1 : index
    %c0_43 = arith.constant 0 : index
    %c0_44 = arith.constant 0 : index
    %70 = vector.load %arg5[%c1_42, %c0_43, %c0_44] : memref<3x2x96xbf16, #tpu.memory_space<vmem>>, vector<1x2x96xbf16>
    %71 = vector.shape_cast %70 : vector<1x2x96xbf16> to vector<2x96xbf16>
    %cst_45 = arith.constant dense<0.000000e+00> : vector<2x128xf32>
    %72 = tpu.matmul %71, %69, %cst_45 {dimension_numbers = #tpu.dot_dimension_numbers<[1], [1], [0], [0], [0, 0, 1, 0], [], []>} : vector<2x96xbf16>, vector<128x96xbf16>, vector<2x128xf32> -> vector<2x128xf32>
    %73 = arith.addf %63, %72 : vector<2x128xf32>
    %c0_46 = arith.constant 0 : index
    %c2_47 = arith.constant 2 : index
    %c0_48 = arith.constant 0 : index
    %74 = vector.load %arg8[%c0_46, %c2_47, %c0_48] : memref<10x24x32xbf16, #tpu.memory_space<vmem>>, vector<10x16x32xbf16>
    %75 = vector.extract_strided_slice %74 {offsets = [0, 0, 0], sizes = [8, 16, 32], strides = [1, 1, 1]} : vector<10x16x32xbf16> to vector<8x16x32xbf16>
    %76 = vector.extract_strided_slice %74 {offsets = [1, 0, 0], sizes = [8, 16, 32], strides = [1, 1, 1]} : vector<10x16x32xbf16> to vector<8x16x32xbf16>
    %77 = vector.extract_strided_slice %74 {offsets = [2, 0, 0], sizes = [8, 16, 32], strides = [1, 1, 1]} : vector<10x16x32xbf16> to vector<8x16x32xbf16>
    %78 = tpu.concatenate %75, %76, %77 in 2 : vector<8x16x32xbf16>, vector<8x16x32xbf16>, vector<8x16x32xbf16> -> vector<8x16x96xbf16>
    %79 = vector.shape_cast %78 : vector<8x16x96xbf16> to vector<128x96xbf16>
    %c2_49 = arith.constant 2 : index
    %c0_50 = arith.constant 0 : index
    %c0_51 = arith.constant 0 : index
    %80 = vector.load %arg5[%c2_49, %c0_50, %c0_51] : memref<3x2x96xbf16, #tpu.memory_space<vmem>>, vector<1x2x96xbf16>
    %81 = vector.shape_cast %80 : vector<1x2x96xbf16> to vector<2x96xbf16>
    %cst_52 = arith.constant dense<0.000000e+00> : vector<2x128xf32>
    %82 = tpu.matmul %81, %79, %cst_52 {dimension_numbers = #tpu.dot_dimension_numbers<[1], [1], [0], [0], [0, 0, 1, 0], [], []>} : vector<2x96xbf16>, vector<128x96xbf16>, vector<2x128xf32> -> vector<2x128xf32>
    %83 = arith.addf %73, %82 : vector<2x128xf32>
    %c0_53 = arith.constant 0 : index
    %c0_54 = arith.constant 0 : index
    %84 = vector.load %arg6[%c0_53, %c0_54] : memref<2x1xf32, #tpu.memory_space<vmem>>, vector<2x1xf32>
    %85 = vector.broadcast %84 : vector<2x1xf32> to vector<2x128xf32>
    %86 = arith.addf %83, %85 : vector<2x128xf32>
    %c0_55 = arith.constant 0 : index
    %c0_56 = arith.constant 0 : index
    %c0_57 = arith.constant 0 : index
    %87 = vector.load %arg7[%c0_55, %c0_56, %c0_57] : memref<1x2x128xf32, #tpu.memory_space<vmem>>, vector<1x2x128xf32>
    %88 = vector.shape_cast %87 : vector<1x2x128xf32> to vector<2x128xf32>
    %89 = vector.shape_cast %86 : vector<2x128xf32> to vector<1x2x128xf32>
    tpu.vector_store %arg7[%c0_55, %c0_56, %c0_57], %89 {strides = array<i32>} : memref<1x2x128xf32, #tpu.memory_space<vmem>>, vector<1x2x128xf32>,
    return
  }
  func.func @transform_0(%arg0: i32, %arg1: i32) -> (i32, i32, i32, i32) {
    %c0_i32 = arith.constant 0 : i32
    %c0_i32_0 = arith.constant 0 : i32
    %c0_i32_1 = arith.constant 0 : i32
    %c0_i32_2 = arith.constant 0 : i32
    return %arg0, %c0_i32, %c0_i32_0, %c0_i32_1 : i32, i32, i32, i32
  }
  func.func @transform_1(%arg0: i32, %arg1: i32) -> (i32, i32, i32) {
    %c0_i32 = arith.constant 0 : i32
    %c0_i32_0 = arith.constant 0 : i32
    %c0_i32_1 = arith.constant 0 : i32
    %c0_i32_2 = arith.constant 0 : i32
    return %c0_i32, %c0_i32_0, %c0_i32_1 : i32, i32, i32
  }
  func.func @transform_2(%arg0: i32, %arg1: i32) -> (i32, i32) {
    %c0_i32 = arith.constant 0 : i32
    %c0_i32_0 = arith.constant 0 : i32
    %c0_i32_1 = arith.constant 0 : i32
    return %c0_i32, %c0_i32_0 : i32, i32
  }
  func.func @transform_3(%arg0: i32, %arg1: i32) -> (i32, i32, i32) {
    %c0_i32 = arith.constant 0 : i32
    %c0_i32_0 = arith.constant 0 : i32
    %c0_i32_1 = arith.constant 0 : i32
    %c0_i32_2 = arith.constant 0 : i32
    return %c0_i32, %c0_i32_0, %c0_i32_1 : i32, i32, i32
  }
  func.func @transform_4(%arg0: i32, %arg1: i32) -> (i32, i32) {
    %c0_i32 = arith.constant 0 : i32
    %c0_i32_0 = arith.constant 0 : i32
    %c0_i32_1 = arith.constant 0 : i32
    return %c0_i32, %c0_i32_0 : i32, i32
  }
  func.func @transform_5(%arg0: i32, %arg1: i32) -> (i32, i32, i32) {
    %c0_i32 = arith.constant 0 : i32
    %c0_i32_0 = arith.constant 0 : i32
    return %arg0, %c0_i32, %arg1 : i32, i32, i32
  }
}

</mosaic_0001>

<bundles_post_ra>
// kernel: tpu_custom_call.1
= control target key start
LH: loop header
LB: loop body
LE: loop exit
PB: predicated region body
PF: predicated region fallthrough
CT: control target
= control target key end

     0   :  { %10 = vsyncpa [#allocation4], 0  ;;  %s4437_s0 = inlined_call_operand.vmem [shape: bf16[2,28,24,16], index: 0, kind: input, shape index: {}]   ;;  %s4438_s1 = inlined_call_operand.vmem [shape: bf16[3,48,32], index: 1, kind: input, shape index: {}]   ;;  %s4439_s2 = inlined_call_operand.vmem [shape: f32[1,32], index: 2, kind: input, shape index: {}]   ;;  %s4440_s3 = inlined_call_operand.vmem [shape: bf16[3,2,96], index: 3, kind: input, shape index: {}]   ;;  %s4441_s4 = inlined_call_operand.vmem [shape: f32[2,1], index: 4, kind: input, shape index: {}]   ;;  %s4442_s5 = inlined_call_operand.hbm [shape: f32[2,2,384], index: 5, kind: output, shape index: {}]  }
   0x1   :  { %12 = vsyncpa [#allocation4 + $0x1], 0  ;;  %s3281_s18 = smov 0   ;;  %s3283_s19 = smov 0  }
   0x2   :  { %s3285_s20 = smov 0   ;;  %s3287_s21 = smov 0  }
   0x3   :  { %s3289_s22 = smov 0   ;;  %s3291_s23 = smov 0  }
   0x4   :  { %s3293_s24 = smov 0   ;;  %s3295_s25 = smov 0  }
   0x5 LB: > { %s2607_s26 = sadd.s32 4294967295, %s3240_s25   ;;  %s2608_s27 = sadd.s32 4294967294, %s3240_s25   ;;  %s3240_s25 = sphi %s3295_s25, %s18_s25   ;;  %s3236_s24 = sphi %s3293_s24, %s4459_s24   ;;  %s3232_s23 = sphi %s3291_s23, %s4458_s23   ;;  %s3228_s22 = sphi %s3289_s22, %s4457_s22   ;;  %s3224_s21 = sphi %s3287_s21, %s4456_s21   ;;  %s3220_s20 = sphi %s3285_s20, %s4455_s20   ;;  %s3216_s19 = sphi %s3283_s19, %s4454_s19   ;;  %s3212_s18 = sphi %s3281_s18, %s4453_s18  }
   0x6   : > { %s27_s28 = sadd.s32 1, %s3232_s23  ;;  %s30_s29 = sadd.s32 1, %s3236_s24 }
   0x7   : > { %p28_p0 = scmp.ge.s32.totalorder %s27_s28, 3  ;;  %p159_p1 = scmp.ne.s32.totalorder %s3220_s20, %s3216_s19 }
   0x8   : > { %p160_p2 = scmp.eq.s32.totalorder %s2607_s26, 5  ;;  %p165_p5 = scmp.ne.s32.totalorder %s3216_s19, %s3212_s18 }
   0x9   : > { %s4461_s28 = smov (%p28_p0, %s27_s28), 0  ;;  %s4463_s29 = smov (!%p28_p0, %s30_s29), %s3236_s24 }
   0xa   : > { %s145_s30 = ssub.s32 %s3232_s23, %s4461_s28  ;;  %p3332_p3 = por %p160_p2, %p159_p1 }
   0xb   : > { %p32_p4 = scmp.ge.s32.totalorder %s4463_s29, 2  ;;  %p166_p6 = scmp.eq.s32.totalorder %s2608_s27, 5 }
   0xc   : > { %p2611_p7 = scmp.ge.s32.totalorder %s3240_s25, 1  ;;  %p204_p9 = scmp.lt.s32.totalorder %s3240_s25, 7 }
   0xd   : > { %s4465_s29 = smov (%p32_p4, %s4463_s29), 0  ;;  %p3341_p8 = por %p166_p6, %p165_p5 }
   0xe   : > { %s144_s8 = ssub.s32 %s3236_s24, %s4465_s29  ;;  %s149_s9 = sadd.s32 1, %s3220_s20 }
   0xf   : > { %s146_s10 = sor.u32 %s145_s30, %s144_s8  ;;  %p205_p10 = pnand %p2611_p7, %p204_p9 }
  0x10   : > { %p147_p11 = scmp.eq.s32.totalorder %s146_s10, 0  ;;  %p232_p12 = scmp.lt.s32.totalorder (!%p205_p10), %s3228_s22, 1 }
  0x11   : > { %208 = sbr.rel (%p205_p10) target bundleno = 994 (0x3e2), region = 40  ;;  %s3242_s15 = smov (!%p205_p10), 32  }
  0x12   : > { %s3350_s11 = scalar_select %p147_p11, %s3220_s20, %s149_s9  }
  0x13   : > { %s2766_s17 = smul.u32 (!%p205_p10), 96, %s3224_s21  ;;  %p2725_p13 = scmp.ne.s32.totalorder (!%p205_p10), %s3224_s21, 0 }
  0x16   : > { %v3103_v0 = vld [vmem:[%s4438_s1 + $0x10] sm:$0xff]   ;;  %v3105_v1 = vld [vmem:[%s4438_s1 + $0x8] sm:$0xff]   ;;  %s233_s16 = scalar_select %p232_p12, %s3228_s22, 1  ;;  %v3108_v2 = vld [vmem:[%s4438_s1] sm:$0xff]   ;;  %vm366_vm0 = vcmask 130048   ;;  %vm397_vm1 = vcmask 261120  }
  0x17   : > { %2879 = vmatprep.subr.bf16.mxu1 %v3103_v0  ;;  %v3109_v3 = vld [vmem:[%s4438_s1 + $0x28] sm:$0xff]   ;;  %v3111_v22 = vld [vmem:[%s4438_s1 + $0x20] sm:$0xff]   ;;  %v3112_v23 = vld [vmem:[%s4438_s1 + $0x18] sm:$0xff]   ;;  %vm688_vm2 = vcmask 392192   ;;  %vm562_vm3 = vsmask.f32 7424 }
  0x18   : > { %s2991_s30 = smul.u32 336, %s233_s16  ;;  %2880 = vmatpush3.bf16.msra.mxu1 %v3103_v0  ;;  %2853 = vmatprep.subr.bf16.mxu0 %v3109_v3  ;;  %s3243_s16 = smov 16   ;;  %v3493_v33 = vld [vmem:[%s4438_s1 + $0x40] sm:$0xff]   ;;  %vm1141_vm4 = vcmask 1046528   ;;  %vm1670_vm5 = vcmask 257024   ;;  %vm1678_vm8 = vcmask 253952  }
  0x19   : > { %2881 = vmatprep.subr.bf16.mxu1 %v3105_v1  ;;  %2854 = vmatpush3.bf16.msra.mxu0 %v3109_v3  ;;  %vm1671_vm6 = vsmask.f32 7938  ;;  %vm1467_vm7 = vsmask.f32 256  ;;  %vm1468_vm9 = vsmask.f32 4368 }
  0x1a   : > { %s236_s13 = scalar_lea.vmem %s4437_s0, %s2991_s30  ;;  %2855 = vmatprep.subr.bf16.mxu0 %v3111_v22  ;;  %vm3857_vm10 = vmand %vm1670_vm5, %vm1671_vm6 }
  0x1b   : > { %s3370_s14 = scalar_lea.vmem %s236_s13, %s2766_s17  ;;  %s229_s17 = sand.u32 1, %s3216_s19   ;;  %vm3865_vm11 = vmand %vm1678_vm8, %vm1467_vm7 }
  0x1c   : > { %v246_v4 = vld [vmem:[%s3370_s14 + $0x18] sm:$0xf]  ;;  %v3374_v5 = vld [vmem:[%s3370_s14 + $0x1c] sm:$0xf]  ;;  %v244_v6 = vld [vmem:[%s3370_s14 + $0xc] sm:$0xf]  ;;  %2882 = vmatpush3.bf16.msra.mxu1 %v3105_v1 }
  0x1d   : > { %v3378_v7 = vcombine.low %v246_v4, %v3374_v5  ;;  %v3381_v8 = vld [vmem:[%s3370_s14 + $0x10] sm:$0xf]  ;;  %v248_v9 = vld [vmem:[%s3370_s14 + $0x24] sm:$0xf]  ;;  %2883 = vmatprep.subr.bf16.mxu1 %v3108_v2  ;;  %v3388_v11 = vld [vmem:[%s3370_s14 + $0x28] sm:$0xf]  ;;  %2856 = vmatpush3.bf16.msra.mxu0 %v3111_v22 }
  0x1e   : > { %v3385_v10 = vcombine.low %v244_v6, %v3381_v8  ;;  %v3393_v12 = vcombine.low %v248_v9, %v3388_v11  ;;  %v3400_v13 = vld [vmem:[%s3370_s14 + $0x20] ss:$0 sps:$4 sm:$0x11]   ;;  %v3405_v14 = vld [vmem:[%s3370_s14 + $0x14] ss:$0 sps:$4 sm:$0x11]   ;;  %2857 = vmatprep.subr.bf16.mxu0 %v3112_v23  ;;  %vm3873_vm12 = vmor %vm1467_vm7, %vm1468_vm9 }
  0x1f   : > { %346 = vrot.lane.b32.xlu1 %v3378_v7, %s3242_s15  ;;  %v3410_v15 = vld [vmem:[%s3370_s14 + $0x2c] ss:$0 sps:$4 sm:$0x11]   ;;  %v250_v16 = vld [vmem:[%s3370_s14 + $0x30] sm:$0xf]  ;;  %s3439_s26 = sshll.u32 %s229_s17, 1  ;;  %vm3911_vm13 = vmand %vm1678_vm8, %vm1671_vm6 }
  0x20   : > { %321 = vrot.lane.b32.xlu0 %v3385_v10, %s3243_s16  ;;  %2884 = vmatpush3.bf16.msra.mxu1 %v3108_v2  ;;  %v3416_v17 = vld [vmem:[%s3370_s14 + $0x34] sm:$0xf]  ;;  %v252_v19 = vld [vmem:[%s3370_s14 + $0x3c] sm:$0xf]  ;;  %v3427_v20 = vld [vmem:[%s3370_s14 + $0x40] sm:$0xf] }
  0x21   : > { %v3421_v18 = vcombine.low %v250_v16, %v3416_v17  ;;  %v3433_v21 = vcombine.low %v252_v19, %v3427_v20  ;;  %v3450_v24 = vld [vmem:[%s3370_s14 + $0x38] ss:$0 sps:$4 sm:$0x11]   ;;  %v3457_v25 = vld [vmem:[%s3370_s14 + $0x44] ss:$0 sps:$4 sm:$0x11]   ;;  %2858 = vmatpush3.bf16.msra.mxu0 %v3112_v23 }
  0x22   : > { %v254_v26 = vld [vmem:[%s3370_s14 + $0x48] sm:$0xf]  ;;  %v3463_v27 = vld [vmem:[%s3370_s14 + $0x4c] sm:$0xf]  ;;  %v256_v29 = vld [vmem:[%s3370_s14 + $0x54] sm:$0xf]  ;;  %2905 = vmatprep.subr.bf16.mxu0 %v3493_v33 }
  0x23   : > { %348 = vrot.lane.b32.xlu1 %v3393_v12, %s3242_s15  ;;  %v3468_v28 = vcombine.low %v254_v26, %v3463_v27  ;;  %v3474_v30 = vld [vmem:[%s3370_s14 + $0x58] sm:$0xf]  ;;  %v3486_v32 = vld [vmem:[%s3370_s14 + $0x50] ss:$0 sps:$4 sm:$0x11]   ;;  %s231_s9 = scalar_lea.vmem [#allocation3], %s3439_s26 }
  0x24   : > { %323 = vrot.lane.b32.xlu0 %v3378_v7, %s3243_s16  ;;  %v3479_v31 = vcombine.low %v256_v29, %v3474_v30  ;;  %v3498_v34 = vld [vmem:[%s3370_s14 + $0x5c] ss:$0 sps:$4 sm:$0x11]   ;;  %v258_v35 = vld [vmem:[%s3370_s14 + $0x60] sm:$0xf] }
  0x25   : > { %v259_v36 = vld [vmem:[%s3370_s14 + $0x64] sm:$0xf]  ;;  %v260_v38 = vld [vmem:[%s3370_s14 + $0x6c] sm:$0xf]  ;;  %v261_v39 = vld [vmem:[%s3370_s14 + $0x70] sm:$0xf] }
  0x26   : > { %v3507_v37 = vcombine.low %v258_v35, %v259_v36  ;;  %v3515_v40 = vcombine.low %v260_v38, %v261_v39  ;;  %v3522_v41 = vld [vmem:[%s3370_s14 + $0x68] ss:$0 sps:$4 sm:$0x11]   ;;  %v3529_v42 = vld [vmem:[%s3370_s14 + $0x74] ss:$0 sps:$4 sm:$0x11]  }
  0x27   : > { %471 = vrot.lane.b32.xlu1 %v3400_v13, %s3243_s16  ;;  %v262_v43 = vld [vmem:[%s3370_s14 + $0x78] sm:$0xf]  ;;  %v263_v44 = vld [vmem:[%s3370_s14 + $0x7c] sm:$0xf]  ;;  %v264_v46 = vld [vmem:[%s3370_s14 + $0x84] sm:$0xf] }
  0x28   : > { %469 = vrot.lane.b32.xlu0 %v3405_v14, %s3243_s16  ;;  %v2627_v45 = vcombine.low %v262_v43, %v263_v44  ;;  %v265_v47 = vld [vmem:[%s3370_s14 + $0x88] sm:$0xf]  ;;  %v3093_v49 = vld [vmem:[%s3370_s14 + $0x80] ss:$0 sps:$4 sm:$0x11]  }
  0x29   : > { %v2628_v48 = vcombine.low %v264_v46, %v265_v47  ;;  %v3094_v50 = vld [vmem:[%s3370_s14 + $0x8c] ss:$0 sps:$4 sm:$0x11]   ;;  %v985_v51 = vld [vmem:[%s3370_s14 + $0x18] sm:$0xe] }
  0x2a   : > { %v984_v52 = vld [vmem:[%s3370_s14 + $0xc] sm:$0xe]  ;;  %v3555_v53 = vcombine.low %v985_v51, %v3374_v5  ;;  %v986_v55 = vld [vmem:[%s3370_s14 + $0x24] sm:$0xe]  ;;  %v987_v57 = vld [vmem:[%s3370_s14 + $0x30] sm:$0xe] }
  0x2b   : > { %494 = vrot.lane.b32.xlu1 %v3410_v15, %s3242_s15  ;;  %v3558_v54 = vcombine.low %v984_v52, %v3381_v8  ;;  %v3565_v56 = vcombine.low %v986_v55, %v3388_v11  ;;  %v3573_v58 = vcombine.low %v987_v57, %v3416_v17  ;;  %v988_v59 = vld [vmem:[%s3370_s14 + $0x3c] sm:$0xe]  ;;  %v989_v61 = vld [vmem:[%s3370_s14 + $0x48] sm:$0xe]  ;;  %v990_v63 = vld [vmem:[%s3370_s14 + $0x54] sm:$0xe] }
  0x2c   : > { %492 = vrot.lane.b32.xlu0 %v3400_v13, %s3242_s15  ;;  %v3581_v60 = vcombine.low %v988_v59, %v3427_v20  ;;  %v3589_v62 = vcombine.low %v989_v61, %v3463_v27  ;;  %v3597_v0 = vcombine.low %v990_v63, %v3474_v30  ;;  %v991_v1 = vld [vmem:[%s3370_s14 + $0x60] sm:$0xe]  ;;  %v992_v3 = vld [vmem:[%s3370_s14 + $0x6c] sm:$0xe]  ;;  %v993_v5 = vld [vmem:[%s3370_s14 + $0x78] sm:$0xe] }
  0x2d   : > { %v3604_v2 = vcombine.low %v991_v1, %v259_v36  ;;  %v3611_v4 = vcombine.low %v992_v3, %v261_v39  ;;  %v2683_v6 = vcombine.low %v993_v5, %v263_v44  ;;  %v242_v8 = vld [vmem:[%s3370_s14] sm:$0xf]  ;;  %v3622_v9 = vld [vmem:[%s3370_s14 + $0x4] sm:$0xf] }
  0x2e   : > { %v994_v11 = vld [vmem:[%s3370_s14 + $0x84] sm:$0xe]  ;;  %v2617_v16 = vcombine.low %v242_v8, %v3622_v9  ;;  %v3110_v39 = vld [vmem:[%s3370_s14 + $0x8] ss:$0 sps:$4 sm:$0x11]   ;;  %v3114_v8 = vld [vmem:[%s4438_s1 + $0x38] sm:$0xff]  }
  0x2f   : > { %327 = vrot.lane.b32.xlu1 %v3421_v18, %s3243_s16  ;;  %v2684_v17 = vcombine.low %v994_v11, %v265_v47 }
  0x30   : > { %325 = vrot.lane.b32.xlu0 %v3393_v12, %s3243_s16 }
  0x33   : > { %352 = vrot.lane.b32.xlu1 %v3433_v21, %s3242_s15 }
  0x34   : > { %350 = vrot.lane.b32.xlu0 %v3421_v18, %s3242_s15 }
  0x37   : > { %475 = vrot.lane.b32.xlu1 %v3450_v24, %s3243_s16 }
  0x38   : > { %473 = vrot.lane.b32.xlu0 %v3410_v15, %s3243_s16 }
  0x3b   : > { %498 = vrot.lane.b32.xlu1 %v3457_v25, %s3242_s15 }
  0x3c   : > { %496 = vrot.lane.b32.xlu0 %v3450_v24, %s3242_s15 }
  0x3f   : > { %331 = vrot.lane.b32.xlu1 %v3468_v28, %s3243_s16 }
  0x40   : > { %329 = vrot.lane.b32.xlu0 %v3433_v21, %s3243_s16 }
  0x43   : > { %356 = vrot.lane.b32.xlu1 %v3479_v31, %s3242_s15 }
  0x44   : > { %354 = vrot.lane.b32.xlu0 %v3468_v28, %s3242_s15 }
  0x47   : > { %479 = vrot.lane.b32.xlu1 %v3486_v32, %s3243_s16 }
  0x48   : > { %477 = vrot.lane.b32.xlu0 %v3457_v25, %s3243_s16 }
  0x4b   : > { %502 = vrot.lane.b32.xlu1 %v3498_v34, %s3242_s15 }
  0x4c   : > { %500 = vrot.lane.b32.xlu0 %v3486_v32, %s3242_s15 }
  0x4f   : > { %335 = vrot.lane.b32.xlu1 %v3507_v37, %s3243_s16 }
  0x50   : > { %333 = vrot.lane.b32.xlu0 %v3479_v31, %s3243_s16 }
  0x53   : > { %360 = vrot.lane.b32.xlu1 %v3515_v40, %s3242_s15 }
  0x54   : > { %358 = vrot.lane.b32.xlu0 %v3507_v37, %s3242_s15 }
  0x57   : > { %483 = vrot.lane.b32.xlu1 %v3522_v41, %s3243_s16 }
  0x58   : > { %481 = vrot.lane.b32.xlu0 %v3498_v34, %s3243_s16 }
  0x5b   : > { %506 = vrot.lane.b32.xlu1 %v3529_v42, %s3242_s15 }
  0x5c   : > { %504 = vrot.lane.b32.xlu0 %v3522_v41, %s3242_s15 }
  0x5f   : > { %339 = vrot.lane.b32.xlu1 %v2627_v45, %s3243_s16 }
  0x60   : > { %337 = vrot.lane.b32.xlu0 %v3515_v40, %s3243_s16 }
  0x63   : > { %364 = vrot.lane.b32.xlu1 %v2628_v48, %s3242_s15 }
  0x64   : > { %362 = vrot.lane.b32.xlu0 %v2627_v45, %s3242_s15 }
  0x67   : > { %487 = vrot.lane.b32.xlu1 %v3093_v49, %s3243_s16 }
  0x68   : > { %485 = vrot.lane.b32.xlu0 %v3529_v42, %s3243_s16 }
  0x6b   : > { %510 = vrot.lane.b32.xlu1 %v3094_v50, %s3242_s15 }
  0x6c   : > { %508 = vrot.lane.b32.xlu0 %v3093_v49, %s3242_s15 }
  0x6f   : > { %1030 = vrot.lane.b32.xlu1 %v3555_v53, %s3243_s16 }
  0x70   : > { %1028 = vrot.lane.b32.xlu0 %v3558_v54, %s3243_s16 }
  0x73   : > { %1053 = vrot.lane.b32.xlu1 %v3565_v56, %s3242_s15 }
  0x74   : > { %1051 = vrot.lane.b32.xlu0 %v3555_v53, %s3242_s15 }
  0x77   : > { %1034 = vrot.lane.b32.xlu1 %v3573_v58, %s3243_s16 }
  0x78   : > { %1032 = vrot.lane.b32.xlu0 %v3565_v56, %s3243_s16 }
  0x7b   : > { %1057 = vrot.lane.b32.xlu1 %v3581_v60, %s3242_s15 }
  0x7c   : > { %1055 = vrot.lane.b32.xlu0 %v3573_v58, %s3242_s15 }
  0x7f   : > { %1038 = vrot.lane.b32.xlu1 %v3589_v62, %s3243_s16 }
  0x80   : > { %1036 = vrot.lane.b32.xlu0 %v3581_v60, %s3243_s16 }
  0x83   : > { %1061 = vrot.lane.b32.xlu1 %v3597_v0, %s3242_s15 }
  0x84   : > { %1059 = vrot.lane.b32.xlu0 %v3589_v62, %s3242_s15 }
  0x87   : > { %1042 = vrot.lane.b32.xlu1 %v3604_v2, %s3243_s16 }
  0x88   : > { %1040 = vrot.lane.b32.xlu0 %v3597_v0, %s3243_s16 }
  0x8b   : > { %1065 = vrot.lane.b32.xlu1 %v3611_v4, %s3242_s15 }
  0x8c   : > { %1063 = vrot.lane.b32.xlu0 %v3604_v2, %s3242_s15 }
  0x8f   : > { %1046 = vrot.lane.b32.xlu1 %v2683_v6, %s3243_s16 }
  0x90   : > { %1044 = vrot.lane.b32.xlu0 %v3611_v4, %s3243_s16 }
  0x91   : > { %v347_v19 = vpop.permute.xlu1 %346 }
  0x92   : > { %v322_v20 = vpop.permute.xlu0 %321 }
  0x93   : > { %v369_v22 = vsel %vm366_vm0, %v2617_v16, %v322_v20  ;;  %1069 = vrot.lane.b32.xlu1 %v2684_v17, %s3242_s15 }
  0x94   : > { %1067 = vrot.lane.b32.xlu0 %v2683_v6, %s3242_s15  ;;  %v399_v23 = vsel %vm397_vm1, %v369_v22, %v347_v19 }
  0x95   : > { %2885 = vmatprep.mubr.msk.bf16.mxu1 %vm688_vm2, %v399_v23  ;;  %v349_v26 = vpop.permute.xlu1 %348  ;;  %v565_v38 = vshll.u32 %v399_v23, 16  ;;  %v563_v55 = vshrl.u32 %v399_v23, 16 }
  0x96   : > { %v324_v27 = vpop.permute.xlu0 %323 }
  0x97   : > { %v372_v29 = vsel %vm366_vm0, %v3385_v10, %v324_v27  ;;  %v567_v47 = vrot.slane %v565_v38, 1 }
  0x98   : > { %v401_v30 = vsel %vm397_vm1, %v372_v29, %v349_v26 }
  0x99   : > { %v575_v35 = vshll.u32 %v401_v30, 16  ;;  %2886 = vmatmul.mubr.msk.bf16.vlgmr.msra.gmra.mxu1 %vm688_vm2, %v401_v30  ;;  %v472_v36 = vpop.permute.xlu1 %471  ;;  %v573_v50 = vshrl.u32 %v401_v30, 16  ;;  %v568_v3 = vor.u32 %v567_v47, %v563_v55 }
  0x9a   : > { %v470_v43 = vpop.permute.xlu0 %469  ;;  %v517_v45 = vsel %vm366_vm0, %v3405_v14, %v472_v36 }
  0x9b   : > { %v577_v44 = vrot.slane %v575_v35, 1  ;;  %v514_v48 = vsel %vm366_vm0, %v3110_v39, %v470_v43 }
  0x9d   : > { %v495_v46 = vpop.permute.xlu1 %494  ;;  %v578_v59 = vor.u32 %v577_v44, %v573_v50 }
  0x9e   : > { %v3643_v49 = vsel %vm397_vm1, %v517_v45, %v495_v46  ;;  %v493_v10 = vpop.permute.xlu0 %492 }
  0x9f   : > { %v579_v51 = vshll.u32 %v3643_v49, 16  ;;  %v3647_v52 = vsel %vm397_vm1, %v514_v48, %v493_v10 }
  0xa0   : > { %v569_v57 = vshll.u32 %v3647_v52, 16 }
  0xa1   : > { %v581_v14 = vrot.slane %v579_v51, 1  ;;  %v328_v61 = vpop.permute.xlu1 %327 }
  0xa2   : > { %v571_v63 = vrot.slane %v569_v57, 1  ;;  %v326_v1 = vpop.permute.xlu0 %325  ;;  %v378_v11 = vsel %vm366_vm0, %v3393_v12, %v328_v61  ;;  %v3115_v12 = vld [vmem:[%s4438_s1 + $0x30] sm:$0xff]  }
  0xa3   : > { %v582_v5 = vsel %vm562_vm3, %v578_v59, %v581_v14  ;;  %v375_v17 = vsel %vm366_vm0, %v3378_v7, %v326_v1 }
  0xa4   : > { %v572_v6 = vsel %vm562_vm3, %v568_v3, %v571_v63 }
  0xa5   : > { %2859 = vmatprep.mubr.msk.bf16.mxu0 %vm688_vm2, %v572_v6  ;;  %v353_v16 = vpop.permute.xlu1 %352 }
  0xa6   : > { %v405_v19 = vsel %vm397_vm1, %v378_v11, %v353_v16  ;;  %v351_v20 = vpop.permute.xlu0 %350  ;;  %2860 = vmatmul.mubr.msk.bf16.vlgmr.msra.gmra.mxu0 %vm688_vm2, %v582_v5 }
  0xa7   : > { %v403_v22 = vsel %vm397_vm1, %v375_v17, %v351_v20  ;;  %2906 = vmatpush3.bf16.msra.mxu0 %v3493_v33  ;;  %v595_v23 = vshll.u32 %v405_v19, 16  ;;  %v593_v43 = vshrl.u32 %v405_v19, 16 }
  0xa8   : > { %2889 = vmatprep.mubr.msk.bf16.mxu1 %vm688_vm2, %v403_v22  ;;  %2907 = vmatprep.subr.bf16.mxu0 %v3114_v8  ;;  %v585_v26 = vshll.u32 %v403_v22, 16  ;;  %v583_v46 = vshrl.u32 %v403_v22, 16 }
  0xa9   : > { %2890 = vmatmul.mubr.msk.bf16.gmra.mxu1 %vm688_vm2, %v405_v19  ;;  %v476_v7 = vpop.permute.xlu1 %475  ;;  %v597_v29 = vrot.slane %v595_v23, 1 }
  0xaa   : > { %v474_v27 = vpop.permute.xlu0 %473  ;;  %v523_v30 = vsel %vm366_vm0, %v3410_v15, %v476_v7  ;;  %v587_v35 = vrot.slane %v585_v26, 1 }
  0xab   : > { %2908 = vmatpush3.bf16.msra.mxu0 %v3114_v8  ;;  %v520_v36 = vsel %vm366_vm0, %v3400_v13, %v474_v27  ;;  %v598_v15 = vor.u32 %v597_v29, %v593_v43 }
  0xac   : > { %2909 = vmatprep.subr.bf16.mxu0 %v3115_v12  ;;  %v588_v50 = vor.u32 %v587_v35, %v583_v46 }
  0xad   : > { %v499_v33 = vpop.permute.xlu1 %498 }
  0xae   : > { %v3674_v38 = vsel %vm397_vm1, %v523_v30, %v499_v33  ;;  %v497_v39 = vpop.permute.xlu0 %496 }
  0xaf   : > { %v599_v44 = vshll.u32 %v3674_v38, 16  ;;  %v3678_v45 = vsel %vm397_vm1, %v520_v36, %v497_v39  ;;  %2910 = vmatpush3.bf16.msra.mxu0 %v3115_v12 }
  0xb0   : > { %v589_v47 = vshll.u32 %v3678_v45, 16 }
  0xb1   : > { %v601_v48 = vrot.slane %v599_v44, 1  ;;  %v332_v10 = vpop.permute.xlu1 %331 }
  0xb2   : > { %v591_v51 = vrot.slane %v589_v47, 1  ;;  %v330_v13 = vpop.permute.xlu0 %329  ;;  %v384_v59 = vsel %vm366_vm0, %v3433_v21, %v332_v10 }
  0xb3   : > { %v602_v55 = vsel %vm562_vm3, %v598_v15, %v601_v48  ;;  %v381_v61 = vsel %vm366_vm0, %v3421_v18, %v330_v13 }
  0xb4   : > { %v592_v57 = vsel %vm562_vm3, %v588_v50, %v591_v51 }
  0xb5   : > { %2863 = vmatprep.mubr.msk.bf16.mxu0 %vm688_vm2, %v592_v57  ;;  %v357_v14 = vpop.permute.xlu1 %356 }
  0xb6   : > { %v409_v63 = vsel %vm397_vm1, %v384_v59, %v357_v14  ;;  %v355_v1 = vpop.permute.xlu0 %354  ;;  %2864 = vmatmul.mubr.msk.bf16.gmra.mxu0 %vm688_vm2, %v602_v55 }
  0xb7   : > { %v407_v3 = vsel %vm397_vm1, %v381_v61, %v355_v1  ;;  %v615_v5 = vshll.u32 %v409_v63, 16  ;;  %v613_v12 = vshrl.u32 %v409_v63, 16 }
  0xb8   : > { %2893 = vmatprep.mubr.msk.bf16.mxu1 %vm688_vm2, %v407_v3  ;;  %v605_v21 = vshll.u32 %v407_v3, 16  ;;  %v603_v26 = vshrl.u32 %v407_v3, 16 }
  0xb9   : > { %2894 = vmatmul.mubr.msk.bf16.gmra.mxu1 %vm688_vm2, %v409_v63  ;;  %v480_v6 = vpop.permute.xlu1 %479  ;;  %v617_v11 = vrot.slane %v615_v5, 1 }
  0xba   : > { %v478_v8 = vpop.permute.xlu0 %477  ;;  %v529_v16 = vsel %vm366_vm0, %v3457_v25, %v480_v6  ;;  %v607_v17 = vrot.slane %v605_v21, 1 }
  0xbb   : > { %v526_v19 = vsel %vm366_vm0, %v3450_v24, %v478_v8  ;;  %v618_v29 = vor.u32 %v617_v11, %v613_v12 }
  0xbc   : > { %v608_v33 = vor.u32 %v607_v17, %v603_v26 }
  0xbd   : > { %v503_v18 = vpop.permute.xlu1 %502 }
  0xbe   : > { %v3698_v20 = vsel %vm397_vm1, %v529_v16, %v503_v18  ;;  %v501_v22 = vpop.permute.xlu0 %500 }
  0xbf   : > { %v619_v23 = vshll.u32 %v3698_v20, 16  ;;  %v3702_v7 = vsel %vm397_vm1, %v526_v19, %v501_v22 }
  0xc0   : > { %v609_v27 = vshll.u32 %v3702_v7, 16 }
  0xc1   : > { %v621_v25 = vrot.slane %v619_v23, 1  ;;  %v336_v30 = vpop.permute.xlu1 %335 }
  0xc2   : > { %v611_v35 = vrot.slane %v609_v27, 1  ;;  %v334_v36 = vpop.permute.xlu0 %333  ;;  %v390_v43 = vsel %vm366_vm0, %v3479_v31, %v336_v30 }
  0xc3   : > { %v622_v24 = vsel %vm562_vm3, %v618_v29, %v621_v25  ;;  %v387_v46 = vsel %vm366_vm0, %v3468_v28, %v334_v36  ;;  %v983_v36 = vld [vmem:[%s3370_s14] sm:$0xe] }
  0xc4   : > { %v612_v39 = vsel %vm562_vm3, %v608_v33, %v611_v35 }
  0xc5   : > { %2867 = vmatprep.mubr.msk.bf16.mxu0 %vm688_vm2, %v612_v39  ;;  %v361_v44 = vpop.permute.xlu1 %360 }
  0xc6   : > { %v413_v47 = vsel %vm397_vm1, %v390_v43, %v361_v44  ;;  %v359_v15 = vpop.permute.xlu0 %358  ;;  %2868 = vmatmul.mubr.msk.bf16.gmra.mxu0 %vm688_vm2, %v622_v24 }
  0xc7   : > { %v411_v48 = vsel %vm397_vm1, %v387_v46, %v359_v15  ;;  %v635_v10 = vshll.u32 %v413_v47, 16  ;;  %v633_v63 = vshrl.u32 %v413_v47, 16 }
  0xc8   : > { %2897 = vmatprep.mubr.msk.bf16.mxu1 %vm688_vm2, %v411_v48  ;;  %v625_v31 = vshll.u32 %v411_v48, 16  ;;  %v623_v5 = vshrl.u32 %v411_v48, 16 }
  0xc9   : > { %2898 = vmatmul.mubr.msk.bf16.gmra.mxu1 %vm688_vm2, %v413_v47  ;;  %v484_v50 = vpop.permute.xlu1 %483  ;;  %v637_v13 = vrot.slane %v635_v10, 1 }
  0xca   : > { %v482_v51 = vpop.permute.xlu0 %481  ;;  %v535_v55 = vsel %vm366_vm0, %v3498_v34, %v484_v50  ;;  %v627_v57 = vrot.slane %v625_v31, 1 }
  0xcb   : > { %v532_v59 = vsel %vm366_vm0, %v3486_v32, %v482_v51  ;;  %v638_v21 = vor.u32 %v637_v13, %v633_v63 }
  0xcc   : > { %v628_v11 = vor.u32 %v627_v57, %v623_v5 }
  0xcd   : > { %v507_v28 = vpop.permute.xlu1 %506 }
  0xce   : > { %v3722_v14 = vsel %vm397_vm1, %v535_v55, %v507_v28  ;;  %v505_v61 = vpop.permute.xlu0 %504 }
  0xcf   : > { %v639_v1 = vshll.u32 %v3722_v14, 16  ;;  %v3726_v3 = vsel %vm397_vm1, %v532_v59, %v505_v61 }
  0xd0   : > { %v629_v6 = vshll.u32 %v3726_v3, 16 }
  0xd1   : > { %v641_v34 = vrot.slane %v639_v1, 1  ;;  %v340_v8 = vpop.permute.xlu1 %339 }
  0xd2   : > { %v631_v16 = vrot.slane %v629_v6, 1  ;;  %v338_v18 = vpop.permute.xlu0 %337  ;;  %v396_v19 = vsel %vm366_vm0, %v3515_v40, %v340_v8  ;;  %v1143_v6 = vrot.slane %v3647_v52, 1 }
  0xd3   : > { %v642_v32 = vsel %vm562_vm3, %v638_v21, %v641_v34  ;;  %v393_v12 = vsel %vm366_vm0, %v3507_v37, %v338_v18 }
  0xd4   : > { %v632_v17 = vsel %vm562_vm3, %v628_v11, %v631_v16  ;;  %v1146_v16 = vrot.slane %v3643_v49, 1  ;;  %v1149_v49 = vrot.slane %v3678_v45, 1 }
  0xd5   : > { %2871 = vmatprep.mubr.msk.bf16.mxu0 %vm688_vm2, %v632_v17  ;;  %v365_v22 = vpop.permute.xlu1 %364 }
  0xd6   : > { %v417_v23 = vsel %vm397_vm1, %v396_v19, %v365_v22  ;;  %v363_v26 = vpop.permute.xlu0 %362  ;;  %2872 = vmatmul.mubr.msk.bf16.gmra.mxu0 %vm688_vm2, %v642_v32 }
  0xd7   : > { %v415_v27 = vsel %vm397_vm1, %v393_v12, %v363_v26  ;;  %v655_v29 = vshll.u32 %v417_v23, 16  ;;  %v653_v46 = vshrl.u32 %v417_v23, 16 }
  0xd8   : > { %2901 = vmatprep.mubr.msk.bf16.mxu1 %vm688_vm2, %v415_v27  ;;  %v645_v25 = vshll.u32 %v415_v27, 16  ;;  %v643_v48 = vshrl.u32 %v415_v27, 16 }
  0xd9   : > { %2902 = vmatmul.mubr.msk.bf16.gmra.mxu1 %vm688_vm2, %v417_v23  ;;  %v488_v40 = vpop.permute.xlu1 %487  ;;  %v657_v33 = vrot.slane %v655_v29, 1 }
  0xda   : > { %v486_v30 = vpop.permute.xlu0 %485  ;;  %v541_v35 = vsel %vm366_vm0, %v3529_v42, %v488_v40  ;;  %v647_v24 = vrot.slane %v645_v25, 1  ;;  %v2673_v42 = vcombine.low %v983_v36, %v3622_v9 }
  0xdb   : > { %v538_v39 = vsel %vm366_vm0, %v3522_v41, %v486_v30  ;;  %v658_v50 = vor.u32 %v657_v33, %v653_v46 }
  0xdc   : > { %v648_v13 = vor.u32 %v647_v24, %v643_v48 }
  0xdd   : > { %v511_v37 = vpop.permute.xlu1 %510 }
  0xde   : > { %v3747_v43 = vsel %vm397_vm1, %v541_v35, %v511_v37  ;;  %v509_v44 = vpop.permute.xlu0 %508 }
  0xdf   : > { %v659_v47 = vshll.u32 %v3747_v43, 16  ;;  %v3751_v15 = vsel %vm397_vm1, %v538_v39, %v509_v44 }
  0xe0   : > { %v649_v10 = vshll.u32 %v3751_v15, 16 }
  0xe1   : > { %v661_v31 = vrot.slane %v659_v47, 1  ;;  %v1031_v51 = vpop.permute.xlu1 %1030 }
  0xe2   : > { %v651_v41 = vrot.slane %v649_v10, 1  ;;  %v1029_v55 = vpop.permute.xlu0 %1028  ;;  %v1076_v28 = vsel %vm366_vm0, %v3558_v54, %v1031_v51 }
  0xe3   : > { %v662_v57 = vsel %vm562_vm3, %v658_v50, %v661_v31  ;;  %v1073_v59 = vsel %vm366_vm0, %v2673_v42, %v1029_v55 }
  0xe4   : > { %v652_v61 = vsel %vm562_vm3, %v648_v13, %v651_v41 }
  0xe5   : > { %2875 = vmatprep.mubr.msk.bf16.mxu0 %vm688_vm2, %v652_v61  ;;  %v1054_v63 = vpop.permute.xlu1 %1053 }
  0xe6   : > { %v1104_v9 = vsel %vm397_vm1, %v1076_v28, %v1054_v63  ;;  %v1052_v1 = vpop.permute.xlu0 %1051  ;;  %2876 = vmatmul.mubr.msk.bf16.gmra.mxu0 %vm688_vm2, %v662_v57 }
  0xe7   : > { %v1102_v5 = vsel %vm397_vm1, %v1073_v59, %v1052_v1  ;;  %v1145_v21 = vrot.slane %v1104_v9, 1 }
  0xe8   : > { %v1142_v54 = vrot.slane %v1102_v5, 1  ;;  %v1170_v5 = vrot.slane %v3747_v43, 1 }
  0xe9   : > { %v1035_v34 = vpop.permute.xlu1 %1034  ;;  %v1147_v17 = vsel %vm1141_vm4, %v1145_v21, %v1146_v16 }
  0xea   : > { %v1033_v8 = vpop.permute.xlu0 %1032  ;;  %v1144_v11 = vsel %vm1141_vm4, %v1142_v54, %v1143_v6  ;;  %v1082_v18 = vsel %vm366_vm0, %v3565_v56, %v1035_v34 }
  0xeb   : > { %2911 = vmatprep.mubr.msk.bf16.mxu0 %vm688_vm2, %v1144_v11  ;;  %v1079_v32 = vsel %vm366_vm0, %v3555_v53, %v1033_v8  ;;  %v1152_v53 = vrot.slane %v3674_v38, 1  ;;  %v1155_v38 = vrot.slane %v3702_v7, 1 }
  0xed   : > { %v1058_v19 = vpop.permute.xlu1 %1057 }
  0xee   : > { %v1108_v52 = vsel %vm397_vm1, %v1082_v18, %v1058_v19  ;;  %v1056_v22 = vpop.permute.xlu0 %1055  ;;  %2912 = vmatmul.mubr.msk.bf16.vlgmr.msra.gmra.mxu0 %vm688_vm2, %v1147_v17 }
  0xef   : > { %v1106_v12 = vsel %vm397_vm1, %v1079_v32, %v1056_v22  ;;  %v1151_v26 = vrot.slane %v1108_v52, 1 }
  0xf0   : > { %v1148_v23 = vrot.slane %v1106_v12, 1 }
  0xf1   : > { %v1039_v56 = vpop.permute.xlu1 %1038  ;;  %v1153_v33 = vsel %vm1141_vm4, %v1151_v26, %v1152_v53 }
  0xf2   : > { %v1037_v27 = vpop.permute.xlu0 %1036  ;;  %v1150_v29 = vsel %vm1141_vm4, %v1148_v23, %v1149_v49  ;;  %v1088_v40 = vsel %vm366_vm0, %v3581_v60, %v1039_v56 }
  0xf3   : > { %2915 = vmatprep.mubr.msk.bf16.mxu0 %vm688_vm2, %v1150_v29  ;;  %v1085_v25 = vsel %vm366_vm0, %v3573_v58, %v1037_v27  ;;  %v1158_v58 = vrot.slane %v3698_v20, 1  ;;  %v1161_v20 = vrot.slane %v3726_v3, 1 }
  0xf5   : > { %v1062_v30 = vpop.permute.xlu1 %1061 }
  0xf6   : > { %v1112_v45 = vsel %vm397_vm1, %v1088_v40, %v1062_v30  ;;  %v1060_v35 = vpop.permute.xlu0 %1059  ;;  %2916 = vmatmul.mubr.msk.bf16.gmra.mxu0 %vm688_vm2, %v1153_v33 }
  0xf7   : > { %v1110_v37 = vsel %vm397_vm1, %v1085_v25, %v1060_v35  ;;  %v1157_v24 = vrot.slane %v1112_v45, 1 }
  0xf8   : > { %v1154_v36 = vrot.slane %v1110_v37, 1 }
  0xf9   : > { %v1043_v60 = vpop.permute.xlu1 %1042  ;;  %v1159_v10 = vsel %vm1141_vm4, %v1157_v24, %v1158_v58 }
  0xfa   : > { %v1041_v39 = vpop.permute.xlu0 %1040  ;;  %v1156_v44 = vsel %vm1141_vm4, %v1154_v36, %v1155_v38  ;;  %v1094_v46 = vsel %vm366_vm0, %v3597_v0, %v1043_v60 }
  0xfb   : > { %2919 = vmatprep.mubr.msk.bf16.mxu0 %vm688_vm2, %v1156_v44  ;;  %v1091_v47 = vsel %vm366_vm0, %v3589_v62, %v1041_v39  ;;  %v1164_v62 = vrot.slane %v3722_v14, 1  ;;  %v1167_v14 = vrot.slane %v3751_v15, 1 }
  0xfd   : > { %v1066_v48 = vpop.permute.xlu1 %1065 }
  0xfe   : > { %v1116_v7 = vsel %vm397_vm1, %v1094_v46, %v1066_v48  ;;  %v1064_v42 = vpop.permute.xlu0 %1063  ;;  %2920 = vmatmul.mubr.msk.bf16.gmra.mxu0 %vm688_vm2, %v1159_v10  ;;  %v3825_v46 = vld [vmem:[%s4439_s2] ss:$0 sm:$0xff] }
  0xff   : > { %v1114_v50 = vsel %vm397_vm1, %v1091_v47, %v1064_v42  ;;  %v1163_v51 = vrot.slane %v1116_v7, 1 }
 0x100   : > { %v1160_v31 = vrot.slane %v1114_v50, 1 }
 0x101   : > { %v1047_v0 = vpop.permute.xlu1 %1046  ;;  %v1165_v59 = vsel %vm1141_vm4, %v1163_v51, %v1164_v62 }
 0x102   : > { %v1045_v13 = vpop.permute.xlu0 %1044  ;;  %v1162_v41 = vsel %vm1141_vm4, %v1160_v31, %v1161_v20  ;;  %v1100_v55 = vsel %vm366_vm0, %v3611_v4, %v1047_v0 }
 0x103   : > { %2923 = vmatprep.mubr.msk.bf16.mxu0 %vm688_vm2, %v1162_v41  ;;  %v1097_v28 = vsel %vm366_vm0, %v3604_v2, %v1045_v13 }
 0x105   : > { %v1070_v57 = vpop.permute.xlu1 %1069 }
 0x106   : > { %v1120_v3 = vsel %vm397_vm1, %v1100_v55, %v1070_v57  ;;  %v1068_v61 = vpop.permute.xlu0 %1067  ;;  %2924 = vmatmul.mubr.msk.bf16.gmra.mxu0 %vm688_vm2, %v1165_v59 }
 0x107   : > { %v1118_v63 = vsel %vm397_vm1, %v1097_v28, %v1068_v61  ;;  %v1169_v1 = vrot.slane %v1120_v3, 1 }
 0x108   : > { %v1166_v9 = vrot.slane %v1118_v63, 1 }
 0x109   : > { %v1171_v2 = vsel %vm1141_vm4, %v1169_v1, %v1170_v5 }
 0x10a   : > { %v1168_v4 = vsel %vm1141_vm4, %v1166_v9, %v1167_v14 }
 0x10b   : > { %2927 = vmatprep.mubr.msk.bf16.mxu0 %vm688_vm2, %v1168_v4 }
 0x10e   : > { %2928 = vmatmul.mubr.msk.bf16.gmra.mxu0 %vm688_vm2, %v1171_v2 }
 0x159   : > { %v2887_v8 = vpop.f32.mrf.mxu1 }
 0x15b   : > { %v904_v16 = vpop.f32.mrf.mxu1 }
 0x15d   : > { %v2888_v18 = vpop.f32.mrf.mxu1 }
 0x15f   : > { %v907_v17 = vpop.f32.mrf.mxu1 }
 0x166   : > { %v2861_v6 = vpop.f32.mrf.mxu0 }
 0x167   : > { %v913_v39 = vadd.f32 %v2887_v8, %v2861_v6 }
 0x168   : > { %v753_v54 = vpop.f32.mrf.mxu0 }
 0x169   : > { %v2891_v52 = vpop.f32.mrf.mxu1  ;;  %v905_v47 = vadd.f32 %v904_v16, %v753_v54 }
 0x16a   : > { %v2862_v21 = vpop.f32.mrf.mxu0 }
 0x16b   : > { %v920_v22 = vpop.f32.mrf.mxu1  ;;  %v916_v7 = vadd.f32 %v2888_v18, %v2862_v21 }
 0x16c   : > { %v756_v34 = vpop.f32.mrf.mxu0 }
 0x16d   : > { %v2892_v49 = vpop.f32.mrf.mxu1  ;;  %v908_v31 = vadd.f32 %v907_v17, %v756_v34 }
 0x16f   : > { %v923_v26 = vpop.f32.mrf.mxu1 }
 0x176   : > { %v2865_v11 = vpop.f32.mrf.mxu0 }
 0x177   : > { %v929_v51 = vadd.f32 %v2891_v52, %v2865_v11 }
 0x178   : > { %v769_v15 = vpop.f32.mrf.mxu0 }
 0x179   : > { %v2895_v27 = vpop.f32.mrf.mxu1  ;;  %v921_v0 = vadd.f32 %v920_v22, %v769_v15 }
 0x17a   : > { %v2866_v32 = vpop.f32.mrf.mxu0 }
 0x17b   : > { %v936_v53 = vpop.f32.mrf.mxu1  ;;  %v3828_v41 = vadd.f32 %v2892_v49, %v2866_v32 }
 0x17c   : > { %v772_v19 = vpop.f32.mrf.mxu0 }
 0x17d   : > { %v2896_v25 = vpop.f32.mrf.mxu1  ;;  %v3831_v59 = vadd.f32 %v923_v26, %v772_v19 }
 0x17f   : > { %v939_v33 = vpop.f32.mrf.mxu1 }
 0x186   : > { %v2869_v43 = vpop.f32.mrf.mxu0 }
 0x187   : > { %v3833_v3 = vadd.f32 %v2895_v27, %v2869_v43 }
 0x188   : > { %v785_v12 = vpop.f32.mrf.mxu0 }
 0x189   : > { %v2899_v35 = vpop.f32.mrf.mxu1  ;;  %v3835_v61 = vadd.f32 %v936_v53, %v785_v12 }
 0x18a   : > { %v2870_v23 = vpop.f32.mrf.mxu0 }
 0x18b   : > { %v952_v36 = vpop.f32.mrf.mxu1  ;;  %v3837_v63 = vadd.f32 %v2896_v25, %v2870_v23 }
 0x18c   : > { %v788_v56 = vpop.f32.mrf.mxu0 }
 0x18d   : > { %v2900_v44 = vpop.f32.mrf.mxu1  ;;  %v3840_v2 = vadd.f32 %v939_v33, %v788_v56  ;;  %v1683_v56 = vld [vmem:[#allocation2 + $0xc] sm:$0xf] }
 0x18f   : > { %v955_v42 = vpop.f32.mrf.mxu1 }
 0x196   : > { %v2873_v29 = vpop.f32.mrf.mxu0 }
 0x197   : > { %v3842_v6 = vadd.f32 %v2899_v35, %v2873_v29 }
 0x198   : > { %v801_v40 = vpop.f32.mrf.mxu0 }
 0x199   : > { %v2903_v62 = vpop.f32.mrf.mxu1  ;;  %v3844_v54 = vadd.f32 %v952_v36, %v801_v40 }
 0x19a   : > { %v2874_v30 = vpop.f32.mrf.mxu0 }
 0x19b   : > { %v3846_v21 = vadd.f32 %v2900_v44, %v2874_v30  ;;  %v968_v8 = vpop.f32.mrf.mxu1 }
 0x19c   : > { %v804_v45 = vpop.f32.mrf.mxu0 }
 0x19d   : > { %v3848_v11 = vadd.f32 %v955_v42, %v804_v45 }
 0x1a6   : > { %v2877_v37 = vpop.f32.mrf.mxu0 }
 0x1a7   : > { %v3850_v32 = vadd.f32 %v2903_v62, %v2877_v37  ;;  %v1673_v37 = vld [vmem:[#allocation2] sm:$0xf] }
 0x1a8   : > { %v817_v38 = vpop.f32.mrf.mxu0 }
 0x1a9   : > { %v3852_v17 = vadd.f32 %v968_v8, %v817_v38 }
 0x1aa   : > { %v3818_v24 = vpop.f32.mrf.mxu0 }
 0x1ac   : > { %v3820_v60 = vpop.f32.mrf.mxu0 }
 0x1ae   : > { %v2913_v58 = vpop.f32.mrf.mxu0 }
 0x1af   : > { %v1342_v48 = vadd.f32 %v2913_v58, %v913_v39 }
 0x1b0   : > { %v1261_v10 = vpop.f32.mrf.mxu0 }
 0x1b1   : > { %v1369_v50 = vadd.f32 %v3825_v46, %v1342_v48  ;;  %v1340_v20 = vadd.f32 %v1261_v10, %v905_v47 }
 0x1b2   : > { %v2914_v13 = vpop.f32.mrf.mxu0 }
 0x1b3   : > { %v1389_v55 = vmax.f32 %v1369_v50, 0.0  ;;  %v1367_v28 = vadd.f32 %v3825_v46, %v1340_v20  ;;  %v1343_v57 = vadd.f32 %v2914_v13, %v916_v7  ;;  %v1687_v20 = vld [vmem:[#allocation2 + $0x14] sm:$0x1] }
 0x1b4   : > { %v1264_v14 = vpop.f32.mrf.mxu0 }
 0x1b5   : > { %v2769_v9 = vpack.c.bf16 %v1389_v55, %v1389_v55  ;;  %v1387_v1 = vmax.f32 %v1367_v28, 0.0  ;;  %v1370_v4 = vadd.f32 %v3825_v46, %v1343_v57  ;;  %v1341_v5 = vadd.f32 %v1264_v14, %v908_v31 }
 0x1b6   : > { %v2917_v34 = vpop.f32.mrf.mxu0 }
 0x1b7   : > { %v1488_v16 = vshrl.u32 %v2769_v9, 16  ;;  %v2767_v15 = vpack.c.bf16 %v1387_v1, %v1387_v1  ;;  %v1390_v18 = vmax.f32 %v1370_v4, 0.0  ;;  %v1368_v19 = vadd.f32 %v3825_v46, %v1341_v5 }
 0x1b8   : > { %v1346_v52 = vadd.f32 %v2917_v34, %v929_v51  ;;  %v1277_v43 = vpop.f32.mrf.mxu0  ;;  %v1491_v12 = vshll.u32 %v2769_v9, 16 }
 0x1b9   : > { %v1490_v22 = vrot.slane %v1488_v16, 7  ;;  %v1471_v49 = vshrl.u32 %v2767_v15, 16  ;;  %v2770_v23 = vpack.c.bf16 %v1390_v18, %v1390_v18  ;;  %v1474_v27 = vshll.u32 %v2767_v15, 16  ;;  %v1680_v15 = vld [vmem:[#allocation2 + $0x8] sm:$0x1] }
 0x1ba   : > { %v1388_v29 = vmax.f32 %v1368_v19, 0.0  ;;  %v1373_v53 = vadd.f32 %v3825_v46, %v1346_v52  ;;  %v1344_v40 = vadd.f32 %v1277_v43, %v921_v0  ;;  %v2918_v25 = vpop.f32.mrf.mxu0 }
 0x1bb   : > { %v1493_v30 = vor.u32 %v1491_v12, %v1490_v22  ;;  %v1494_v33 = vrot.slane %v1490_v22, 4  ;;  %v1473_v45 = vrot.slane %v1471_v49, 7  ;;  %v1496_v35 = vshrl.u32 %v2770_v23, 16  ;;  %v1697_v49 = vld [vmem:[#allocation2 + $0x24] sm:$0xf] }
 0x1bc   : > { %v1499_v38 = vshll.u32 %v2770_v23, 16  ;;  %v2768_v36 = vpack.c.bf16 %v1388_v29, %v1388_v29  ;;  %v1393_v39 = vmax.f32 %v1373_v53, 0.0  ;;  %v1371_v44 = vadd.f32 %v3825_v46, %v1344_v40  ;;  %v1280_v58 = vpop.f32.mrf.mxu0 }
 0x1bd   : > { %v1684_v48 = vsel %vm3857_vm10, %v1493_v30, %v1683_v56  ;;  %v1476_v10 = vor.u32 %v1474_v27, %v1473_v45  ;;  %v1477_v7 = vrot.slane %v1473_v45, 4  ;;  %v1498_v42 = vrot.slane %v1496_v35, 7 }
 0x1be   : > { %1685 = vst [vmem:[#allocation2 + $0xc] sm:$0xf] %v1684_v48  ;;  %v1479_v31 = vshrl.u32 %v2768_v36, 16  ;;  %v1482_v51 = vshll.u32 %v2768_v36, 16  ;;  %v2773_v0 = vpack.c.bf16 %v1393_v39, %v1393_v39  ;;  %v1391_v13 = vmax.f32 %v1371_v44, 0.0  ;;  %v2921_v62 = vpop.f32.mrf.mxu0 }
 0x1bf   : > { %v1674_v55 = vsel %vm3857_vm10, %v1476_v10, %v1673_v37  ;;  %v1501_v28 = vor.u32 %v1499_v38, %v1498_v42  ;;  %v1503_v57 = vrot.slane %v1498_v42, 4  ;;  %v1347_v14 = vadd.f32 %v2918_v25, %v3828_v41  ;;  %v1690_v39 = vld [vmem:[#allocation2 + $0x18] sm:$0xf] }
 0x1c0   : > { %1675 = vst [vmem:[#allocation2] sm:$0xf] %v1674_v55  ;;  %v1481_v9 = vrot.slane %v1479_v31, 7  ;;  %v1522_v1 = vshrl.u32 %v2773_v0, 16  ;;  %v1525_v4 = vshll.u32 %v2773_v0, 16  ;;  %v2771_v5 = vpack.c.bf16 %v1391_v13, %v1391_v13  ;;  %v1293_v34 = vpop.f32.mrf.mxu0 }
 0x1c1   : > { %v1502_v8 = vsel %vm3873_vm12, %v1494_v33, %v1501_v28  ;;  %v1688_v16 = vsel %vm3865_vm11, %v1503_v57, %v1687_v20  ;;  %v1374_v18 = vadd.f32 %v3825_v46, %v1347_v14  ;;  %v1345_v19 = vadd.f32 %v1280_v58, %v3831_v59 }
 0x1c2   : > { %1686 = vst.msk [vmem:[#allocation2 + $0x10] sm:$0xf] %vm1670_vm5, %v1502_v8  ;;  %1689 = vst [vmem:[#allocation2 + $0x14] sm:$0x1] %v1688_v16  ;;  %v1484_v41 = vor.u32 %v1482_v51, %v1481_v9  ;;  %v1486_v52 = vrot.slane %v1481_v9, 4  ;;  %v3887_v43 = vrot.slane %v1522_v1, 7  ;;  %v2922_v12 = vpop.f32.mrf.mxu0  ;;  %v1350_v29 = vadd.f32 %v2921_v62, %v3833_v3 }
 0x1c3   : > { %v1505_v22 = vshrl.u32 %v2771_v5, 16  ;;  %v1508_v23 = vshll.u32 %v2771_v5, 16  ;;  %v1394_v56 = vmax.f32 %v1374_v18, 0.0  ;;  %v1372_v27 = vadd.f32 %v3825_v46, %v1345_v19 }
 0x1c4   : > { %v1485_v53 = vsel %vm3873_vm12, %v1477_v7, %v1484_v41  ;;  %v1681_v59 = vsel %vm3865_vm11, %v1486_v52, %v1680_v15  ;;  %v1527_v40 = vor.u32 %v1525_v4, %v3887_v43  ;;  %v1528_v25 = vrot.slane %v3887_v43, 4  ;;  %v1296_v30 = vpop.f32.mrf.mxu0  ;;  %v1701_v4 = vld [vmem:[#allocation2 + $0x2c] sm:$0x1] }
 0x1c5   : > { %v1749_v33 = vld [vmem:[#allocation2 + $0xc] sm:$0x1]  ;;  %1677 = vst.msk [vmem:[#allocation2 + $0x4] sm:$0xf] %vm1670_vm5, %v1485_v53  ;;  %1682 = vst [vmem:[#allocation2 + $0x8] sm:$0x1] %v1681_v59  ;;  %v2774_v35 = vpack.c.bf16 %v1394_v56, %v1394_v56  ;;  %v1377_v3 = vadd.f32 %v3825_v46, %v1350_v29  ;;  %v1348_v44 = vadd.f32 %v1293_v34, %v3835_v61 }
 0x1c6   : > { %v3898_v45 = vrot.slane %v1505_v22, 7  ;;  %v1392_v37 = vmax.f32 %v1372_v27, 0.0  ;;  %v1750_v38 = vsel %vm3865_vm11, 0, %v1749_v33  ;;  %v1698_v36 = vsel %vm3857_vm10, %v1527_v40, %v1697_v49  ;;  %v3907_v48 = vpop.f32.mrf.mxu0  ;;  %v1694_v27 = vld [vmem:[#allocation2 + $0x20] sm:$0x1] }
 0x1c7   : > { %v1351_v58 = vadd.f32 %v2922_v12, %v3837_v63  ;;  %1751 = vst [vmem:[#allocation2 + $0xc] sm:$0x1] %v1750_v38  ;;  %v1746_v7 = vld [vmem:[#allocation2] sm:$0x1]  ;;  %1699 = vst [vmem:[#allocation2 + $0x24] sm:$0xf] %v1698_v36  ;;  %v1375_v13 = vadd.f32 %v3825_v46, %v1348_v44  ;;  %v1349_v9 = vadd.f32 %v1296_v30, %v3840_v2 }
 0x1c8   : > { %v1510_v42 = vor.u32 %v1508_v23, %v3898_v45  ;;  %v1511_v20 = vrot.slane %v3898_v45, 4  ;;  %v1530_v31 = vshrl.u32 %v2774_v35, 16  ;;  %v1533_v51 = vshll.u32 %v2774_v35, 16  ;;  %v1309_v62 = vpop.f32.mrf.mxu0  ;;  %v1711_v35 = vld [vmem:[#allocation2 + $0x3c] sm:$0xf] }
 0x1c9   : > { %v1747_v61 = vsel %vm3865_vm11, 0, %v1746_v7  ;;  %v2772_v63 = vpack.c.bf16 %v1392_v37, %v1392_v37  ;;  %v1397_v0 = vmax.f32 %v1377_v3, 0.0  ;;  %v1780_v55 = vld [vmem:[#allocation2 + $0x14] sm:$0x1]  ;;  %v1378_v14 = vadd.f32 %v3825_v46, %v1351_v58 }
 0x1ca   : > { %1748 = vst [vmem:[#allocation2] sm:$0x1] %v1747_v61  ;;  %v1691_v28 = vsel %vm3857_vm10, %v1510_v42, %v1690_v39  ;;  %v1532_v57 = vrot.slane %v1530_v31, 7  ;;  %v1781_v1 = vsel %vm3911_vm13, 0, %v1780_v55  ;;  %v1395_v18 = vmax.f32 %v1375_v13, 0.0  ;;  %v2926_v41 = vpop.f32.mrf.mxu0 }
 0x1cb   : > { %1692 = vst [vmem:[#allocation2 + $0x18] sm:$0xf] %v1691_v28  ;;  %v1513_v5 = vshrl.u32 %v2772_v63, 16  ;;  %v1516_v34 = vshll.u32 %v2772_v63, 16  ;;  %v2777_v8 = vpack.c.bf16 %v1397_v0, %v1397_v0  ;;  %1782 = vst [vmem:[#allocation2 + $0x14] sm:$0x1] %v1781_v1  ;;  %v1376_v2 = vadd.f32 %v3825_v46, %v1349_v9 }
 0x1cc   : > { %v1535_v16 = vor.u32 %v1533_v51, %v1532_v57  ;;  %v1537_v15 = vrot.slane %v1532_v57, 4  ;;  %v1398_v19 = vmax.f32 %v1378_v14, 0.0  ;;  %v1777_v52 = vld [vmem:[#allocation2 + $0x8] sm:$0x1]  ;;  %v2775_v29 = vpack.c.bf16 %v1395_v18, %v1395_v18  ;;  %v1312_v38 = vpop.f32.mrf.mxu0 }
 0x1cd   : > { %v1515_v43 = vrot.slane %v1513_v5, 7  ;;  %v1556_v22 = vshrl.u32 %v2777_v8, 16  ;;  %v1559_v12 = vshll.u32 %v2777_v8, 16  ;;  %v1778_v49 = vsel %vm3911_vm13, 0, %v1777_v52 }
 0x1ce   : > { %v1536_v23 = vsel %vm3873_vm12, %v1528_v25, %v1535_v16  ;;  %v1702_v56 = vsel %vm3865_vm11, %v1537_v15, %v1701_v4  ;;  %1779 = vst [vmem:[#allocation2 + $0x8] sm:$0x1] %v1778_v49  ;;  %v1755_v53 = vld [vmem:[#allocation2 + $0x24] sm:$0x1]  ;;  %v2778_v33 = vpack.c.bf16 %v1398_v19, %v1398_v19  ;;  %v1539_v37 = vshrl.u32 %v2775_v29, 16  ;;  %v2929_v1 = vpop.f32.mrf.mxu0 }
 0x1cf   : > { %1700 = vst.msk [vmem:[#allocation2 + $0x28] sm:$0xf] %vm1670_vm5, %v1536_v23  ;;  %1703 = vst [vmem:[#allocation2 + $0x2c] sm:$0x1] %v1702_v56  ;;  %v1518_v59 = vor.u32 %v1516_v34, %v1515_v43  ;;  %v1520_v40 = vrot.slane %v1515_v43, 4  ;;  %v1558_v30 = vrot.slane %v1556_v22, 7  ;;  %v1354_v13 = vadd.f32 %v3907_v48, %v3842_v6  ;;  %v2904_v23 = vpop.f32.mrf.mxu1 }
 0x1d0   : > { %v1756_v45 = vsel %vm3865_vm11, 0, %v1755_v53  ;;  %v1542_v25 = vshll.u32 %v2775_v29, 16  ;;  %v1396_v3 = vmax.f32 %v1376_v2, 0.0  ;;  %v1541_v42 = vrot.slane %v1539_v37, 7  ;;  %v1715_v4 = vld [vmem:[#allocation2 + $0x44] sm:$0x1]  ;;  %v1325_v49 = vpop.f32.mrf.mxu0 }
 0x1d1   : > { %1757 = vst [vmem:[#allocation2 + $0x24] sm:$0x1] %v1756_v45  ;;  %v1519_v36 = vsel %vm3873_vm12, %v1511_v20, %v1518_v59  ;;  %v1695_v39 = vsel %vm3865_vm11, %v1520_v40, %v1694_v27  ;;  %v1561_v44 = vor.u32 %v1559_v12, %v1558_v30  ;;  %v1562_v58 = vrot.slane %v1558_v30, 4  ;;  %v1704_v20 = vld [vmem:[#allocation2 + $0x30] sm:$0xf] }
 0x1d2   : > { %v1752_v7 = vld [vmem:[#allocation2 + $0x18] sm:$0x1]  ;;  %1693 = vst.msk [vmem:[#allocation2 + $0x1c] sm:$0xf] %vm1670_vm5, %v1519_v36  ;;  %1696 = vst [vmem:[#allocation2 + $0x20] sm:$0x1] %v1695_v39  ;;  %v2776_v61 = vpack.c.bf16 %v1396_v3, %v1396_v3  ;;  %v1352_v55 = vadd.f32 %v1309_v62, %v3844_v54  ;;  %v1544_v28 = vor.u32 %v1542_v25, %v1541_v42 }
 0x1d3   : > { %v1564_v31 = vshrl.u32 %v2778_v33, 16  ;;  %v1567_v51 = vshll.u32 %v2778_v33, 16  ;;  %v1753_v63 = vsel %vm3865_vm11, 0, %v1752_v7  ;;  %v1712_v0 = vsel %vm3857_vm10, %v1561_v44, %v1711_v35  ;;  %v1708_v19 = vld [vmem:[#allocation2 + $0x38] sm:$0x1]  ;;  %v971_v7 = vpop.f32.mrf.mxu1 }
 0x1d4   : > { %1754 = vst [vmem:[#allocation2 + $0x18] sm:$0x1] %v1753_v63  ;;  %1713 = vst [vmem:[#allocation2 + $0x3c] sm:$0xf] %v1712_v0  ;;  %v1545_v57 = vrot.slane %v1541_v42, 4  ;;  %v1547_v9 = vshrl.u32 %v2776_v61, 16  ;;  %v1381_v34 = vadd.f32 %v3825_v46, %v1354_v13  ;;  %v1379_v8 = vadd.f32 %v3825_v46, %v1352_v55 }
 0x1d5   : > { %v1566_v14 = vrot.slane %v1564_v31, 7  ;;  %v1550_v5 = vshll.u32 %v2776_v61, 16  ;;  %v1355_v16 = vadd.f32 %v2926_v41, %v3846_v21  ;;  %v1705_v6 = vsel %vm3857_vm10, %v1544_v28, %v1704_v20  ;;  %v1725_v36 = vld [vmem:[#allocation2 + $0x54] sm:$0xf] }
 0x1d6   : > { %v1786_v15 = vld [vmem:[#allocation2 + $0x2c] sm:$0x1]  ;;  %v1549_v62 = vrot.slane %v1547_v9, 7  ;;  %1706 = vst [vmem:[#allocation2 + $0x30] sm:$0xf] %v1705_v6  ;;  %v1401_v52 = vmax.f32 %v1381_v34, 0.0  ;;  %v1353_v59 = vadd.f32 %v1312_v38, %v3848_v11  ;;  %v1358_v45 = vadd.f32 %v2929_v1, %v3850_v32  ;;  %v2930_v32 = vpop.f32.mrf.mxu0 }
 0x1d7   : > { %v1569_v54 = vor.u32 %v1567_v51, %v1566_v14  ;;  %v1571_v48 = vrot.slane %v1566_v14, 4  ;;  %v1787_v18 = vsel %vm3911_vm13, 0, %v1786_v15  ;;  %v1399_v43 = vmax.f32 %v1379_v8, 0.0  ;;  %v1718_v51 = vld [vmem:[#allocation2 + $0x48] sm:$0xf] }
 0x1d8   : > { %v1382_v22 = vadd.f32 %v3825_v46, %v1355_v16  ;;  %1788 = vst [vmem:[#allocation2 + $0x2c] sm:$0x1] %v1787_v18  ;;  %v1552_v12 = vor.u32 %v1550_v5, %v1549_v62  ;;  %v1554_v2 = vrot.slane %v1549_v62, 4  ;;  %v2781_v27 = vpack.c.bf16 %v1401_v52, %v1401_v52  ;;  %v1729_v15 = vld [vmem:[#allocation2 + $0x5c] sm:$0x1]  ;;  %v1328_v52 = vpop.f32.mrf.mxu0 }
 0x1d9   : > { %v1570_v21 = vsel %vm3873_vm12, %v1562_v58, %v1569_v54  ;;  %v1716_v41 = vsel %vm3865_vm11, %v1571_v48, %v1715_v4  ;;  %v1783_v56 = vld [vmem:[#allocation2 + $0x20] sm:$0x1]  ;;  %v2779_v29 = vpack.c.bf16 %v1399_v43, %v1399_v43  ;;  %v980_v35 = vadd.f32 %v2904_v23, %v3818_v24 }
 0x1da   : > { %1714 = vst.msk [vmem:[#allocation2 + $0x40] sm:$0xf] %vm1670_vm5, %v1570_v21  ;;  %1717 = vst [vmem:[#allocation2 + $0x44] sm:$0x1] %v1716_v41  ;;  %v1402_v53 = vmax.f32 %v1382_v22, 0.0  ;;  %v1784_v40 = vsel %vm3911_vm13, 0, %v1783_v56  ;;  %v1553_v30 = vsel %vm3873_vm12, %v1545_v57, %v1552_v12  ;;  %v1709_v33 = vsel %vm3865_vm11, %v1554_v2, %v1708_v19 }
 0x1db   : > { %1785 = vst [vmem:[#allocation2 + $0x20] sm:$0x1] %v1784_v40  ;;  %v1761_v37 = vld [vmem:[#allocation2 + $0x3c] sm:$0x1]  ;;  %1707 = vst.msk [vmem:[#allocation2 + $0x34] sm:$0xf] %vm1670_vm5, %v1553_v30  ;;  %v1380_v44 = vadd.f32 %v3825_v46, %v1353_v59  ;;  %v1385_v58 = vadd.f32 %v3825_v46, %v1358_v45  ;;  %v1356_v61 = vadd.f32 %v1325_v49, %v3852_v17 }
 0x1dc   : > { %1710 = vst [vmem:[#allocation2 + $0x38] sm:$0x1] %v1709_v33  ;;  %v1590_v25 = vshrl.u32 %v2781_v27, 16  ;;  %v1593_v11 = vshll.u32 %v2781_v27, 16  ;;  %v1573_v3 = vshrl.u32 %v2779_v29, 16  ;;  %v1762_v38 = vsel %vm3865_vm11, 0, %v1761_v37 }
 0x1dd   : > { %v2782_v39 = vpack.c.bf16 %v1402_v53, %v1402_v53  ;;  %1763 = vst [vmem:[#allocation2 + $0x3c] sm:$0x1] %v1762_v38  ;;  %v1576_v31 = vshll.u32 %v2779_v29, 16  ;;  %v972_v63 = vadd.f32 %v971_v7, %v3820_v60  ;;  %v1758_v0 = vld [vmem:[#allocation2 + $0x30] sm:$0x1]  ;;  %v1400_v13 = vmax.f32 %v1380_v44, 0.0 }
 0x1de   : > { %v1592_v24 = vrot.slane %v1590_v25, 7  ;;  %v1575_v42 = vrot.slane %v1573_v3, 7  ;;  %v1405_v55 = vmax.f32 %v1385_v58, 0.0  ;;  %v1759_v28 = vsel %vm3865_vm11, 0, %v1758_v0  ;;  %v1722_v56 = vld [vmem:[#allocation2 + $0x50] sm:$0x1] }
 0x1df   : > { %v1598_v20 = vshrl.u32 %v2782_v39, 16  ;;  %v1359_v9 = vadd.f32 %v2930_v32, %v980_v35  ;;  %1760 = vst [vmem:[#allocation2 + $0x30] sm:$0x1] %v1759_v28  ;;  %v1601_v5 = vshll.u32 %v2782_v39, 16  ;;  %v2780_v34 = vpack.c.bf16 %v1400_v13, %v1400_v13  ;;  %v1739_v45 = vld [vmem:[#allocation2 + $0x6c] sm:$0xf] }
 0x1e0   : > { %v1595_v57 = vor.u32 %v1593_v11, %v1592_v24  ;;  %v1578_v14 = vor.u32 %v1576_v31, %v1575_v42  ;;  %v2785_v8 = vpack.c.bf16 %v1405_v55, %v1405_v55  ;;  %v1383_v6 = vadd.f32 %v3825_v46, %v1356_v61  ;;  %v1732_v31 = vld [vmem:[#allocation2 + $0x60] sm:$0xf]  ;;  %v1743_v28 = vld [vmem:[#allocation2 + $0x74] sm:$0x1] }
 0x1e1   : > { %v1792_v1 = vld [vmem:[#allocation2 + $0x44] sm:$0x1]  ;;  %v1600_v4 = vrot.slane %v1598_v20, 7  ;;  %v1596_v48 = vrot.slane %v1592_v24, 4  ;;  %v1581_v19 = vshrl.u32 %v2780_v34, 16  ;;  %v1584_v22 = vshll.u32 %v2780_v34, 16 }
 0x1e2   : > { %v1793_v17 = vsel %vm3911_vm13, 0, %v1792_v1  ;;  %v1726_v60 = vsel %vm3857_vm10, %v1595_v57, %v1725_v36  ;;  %v1719_v16 = vsel %vm3857_vm10, %v1578_v14, %v1718_v51  ;;  %v1624_v21 = vshrl.u32 %v2785_v8, 16 }
 0x1e3   : > { %1794 = vst [vmem:[#allocation2 + $0x44] sm:$0x1] %v1793_v17  ;;  %v1789_v54 = vld [vmem:[#allocation2 + $0x38] sm:$0x1]  ;;  %1727 = vst [vmem:[#allocation2 + $0x54] sm:$0xf] %v1726_v60  ;;  %v1603_v62 = vor.u32 %v1601_v5, %v1600_v4  ;;  %v1386_v23 = vadd.f32 %v3825_v46, %v1359_v9  ;;  %v1357_v59 = vadd.f32 %v1328_v52, %v972_v63 }
 0x1e4   : > { %1720 = vst [vmem:[#allocation2 + $0x48] sm:$0xf] %v1719_v16  ;;  %v1605_v18 = vrot.slane %v1600_v4, 4  ;;  %v1790_v43 = vsel %vm3911_vm13, 0, %v1789_v54  ;;  %v1403_v41 = vmax.f32 %v1383_v6, 0.0  ;;  %v1583_v49 = vrot.slane %v1581_v19, 7 }
 0x1e5   : > { %1791 = vst [vmem:[#allocation2 + $0x38] sm:$0x1] %v1790_v43  ;;  %v1604_v12 = vsel %vm3873_vm12, %v1596_v48, %v1603_v62  ;;  %v1626_v27 = vrot.slane %v1624_v21, 7  ;;  %v1627_v29 = vshll.u32 %v2785_v8, 16  ;;  %v1579_v40 = vrot.slane %v1575_v42, 4 }
 0x1e6   : > { %v1730_v2 = vsel %vm3865_vm11, %v1605_v18, %v1729_v15  ;;  %1728 = vst.msk [vmem:[#allocation2 + $0x58] sm:$0xf] %vm1670_vm5, %v1604_v12  ;;  %v2783_v53 = vpack.c.bf16 %v1403_v41, %v1403_v41  ;;  %v1586_v30 = vor.u32 %v1584_v22, %v1583_v49  ;;  %v1588_v33 = vrot.slane %v1583_v49, 4  ;;  %v1736_v6 = vld [vmem:[#allocation2 + $0x68] sm:$0x1] }
 0x1e7   : > { %1731 = vst [vmem:[#allocation2 + $0x5c] sm:$0x1] %v1730_v2  ;;  %v1406_v35 = vmax.f32 %v1386_v23, 0.0  ;;  %v1629_v37 = vor.u32 %v1627_v29, %v1626_v27  ;;  %v1384_v36 = vadd.f32 %v3825_v46, %v1357_v59  ;;  %v1630_v14 = vrot.slane %v1626_v27, 4 }
 0x1e8   : > { %v1607_v25 = vshrl.u32 %v2783_v53, 16  ;;  %v1587_v11 = vsel %vm3873_vm12, %v1579_v40, %v1586_v30  ;;  %v1723_v3 = vsel %vm3865_vm11, %v1588_v33, %v1722_v56  ;;  %v1610_v7 = vshll.u32 %v2783_v53, 16 }
 0x1e9   : > { %v2786_v38 = vpack.c.bf16 %v1406_v35, %v1406_v35  ;;  %1721 = vst.msk [vmem:[#allocation2 + $0x4c] sm:$0xf] %vm1670_vm5, %v1587_v11  ;;  %1724 = vst [vmem:[#allocation2 + $0x50] sm:$0x1] %v1723_v3  ;;  %v1740_v58 = vsel %vm3857_vm10, %v1629_v37, %v1739_v45  ;;  %v1404_v61 = vmax.f32 %v1384_v36, 0.0 }
 0x1ea   : > { %v1767_v39 = vld [vmem:[#allocation2 + $0x54] sm:$0x1]  ;;  %v1609_v32 = vrot.slane %v1607_v25, 7  ;;  %1741 = vst [vmem:[#allocation2 + $0x6c] sm:$0xf] %v1740_v58 }
 0x1eb   : > { %v1764_v44 = vld [vmem:[#allocation2 + $0x48] sm:$0x1]  ;;  %v1768_v24 = vsel %vm3865_vm11, 0, %v1767_v39  ;;  %v1632_v51 = vshrl.u32 %v2786_v38, 16  ;;  %v1635_v20 = vshll.u32 %v2786_v38, 16  ;;  %v2784_v57 = vpack.c.bf16 %v1404_v61, %v1404_v61 }
 0x1ec   : > { %v1765_v42 = vsel %vm3865_vm11, 0, %v1764_v44  ;;  %1769 = vst [vmem:[#allocation2 + $0x54] sm:$0x1] %v1768_v24  ;;  %v1612_v46 = vor.u32 %v1610_v7, %v1609_v32  ;;  %v1613_v54 = vrot.slane %v1609_v32, 4 }
 0x1ed   : > { %1766 = vst [vmem:[#allocation2 + $0x48] sm:$0x1] %v1765_v42  ;;  %v1634_v0 = vrot.slane %v1632_v51, 7  ;;  %v1615_v4 = vshrl.u32 %v2784_v57, 16  ;;  %v1618_v16 = vshll.u32 %v2784_v57, 16 }
 0x1ee   : > { %v1798_v63 = vld [vmem:[#allocation2 + $0x5c] sm:$0x1]  ;;  %v1733_v55 = vsel %vm3857_vm10, %v1612_v46, %v1732_v31 }
 0x1ef   : > { %v1799_v13 = vsel %vm3911_vm13, 0, %v1798_v63  ;;  %1734 = vst [vmem:[#allocation2 + $0x60] sm:$0xf] %v1733_v55  ;;  %v1637_v9 = vor.u32 %v1635_v20, %v1634_v0  ;;  %v1639_v1 = vrot.slane %v1634_v0, 4  ;;  %v1617_v60 = vrot.slane %v1615_v4, 7 }
 0x1f0   : > { %1800 = vst [vmem:[#allocation2 + $0x5c] sm:$0x1] %v1799_v13  ;;  %v1795_v5 = vld [vmem:[#allocation2 + $0x50] sm:$0x1] }
 0x1f1   : > { %v1638_v34 = vsel %vm3873_vm12, %v1630_v14, %v1637_v9  ;;  %v1744_v8 = vsel %vm3865_vm11, %v1639_v1, %v1743_v28  ;;  %v1796_v17 = vsel %vm3911_vm13, 0, %v1795_v5  ;;  %v1773_v26 = vld [vmem:[#allocation2 + $0x6c] sm:$0x1]  ;;  %v1620_v48 = vor.u32 %v1618_v16, %v1617_v60 }
 0x1f2   : > { %1742 = vst.msk [vmem:[#allocation2 + $0x70] sm:$0xf] %vm1670_vm5, %v1638_v34  ;;  %1745 = vst [vmem:[#allocation2 + $0x74] sm:$0x1] %v1744_v8  ;;  %v1774_v15 = vsel %vm3865_vm11, 0, %v1773_v26  ;;  %v1622_v62 = vrot.slane %v1617_v60, 4 }
 0x1f3   : > { %1797 = vst [vmem:[#allocation2 + $0x50] sm:$0x1] %v1796_v17  ;;  %1775 = vst [vmem:[#allocation2 + $0x6c] sm:$0x1] %v1774_v15  ;;  %v1621_v19 = vsel %vm3873_vm12, %v1613_v54, %v1620_v48 }
 0x1f4   : > { %v1737_v52 = vsel %vm3865_vm11, %v1622_v62, %v1736_v6  ;;  %1735 = vst.msk [vmem:[#allocation2 + $0x64] sm:$0xf] %vm1670_vm5, %v1621_v19 }
 0x1f5   : > { %1738 = vst [vmem:[#allocation2 + $0x68] sm:$0x1] %v1737_v52 }
 0x1f6   : > { %v1770_v18 = vld [vmem:[#allocation2 + $0x60] sm:$0x1] }
 0x1f7   : > { %v1771_v43 = vsel %vm3865_vm11, 0, %v1770_v18 }
 0x1f8   : > { %1772 = vst [vmem:[#allocation2 + $0x60] sm:$0x1] %v1771_v43 }
 0x1f9   : > { %v1804_v22 = vld [vmem:[#allocation2 + $0x74] sm:$0x1] }
 0x1fa   : > { %v1805_v21 = vsel %vm3911_vm13, 0, %v1804_v22  ;;  %1810 = sbr.rel (%p2725_p13) target bundleno = 514 (0x202), region = 44 }
 0x1fb   : > { %1806 = vst [vmem:[#allocation2 + $0x74] sm:$0x1] %v1805_v21 }
 0x1fc   : > { %v1801_v41 = vld [vmem:[#allocation2 + $0x68] sm:$0x1] }
 0x1fd   : > { %v1802_v50 = vsel %vm3911_vm13, 0, %v1801_v41 }
 0x1fe   : > { %1803 = vst [vmem:[#allocation2 + $0x68] sm:$0x1] %v1802_v50 }
 0x1ff   : > { %v3244_v47 = vmov 0  }
 0x200   : > { %1811 = vst.msk [vmem:[#allocation2] sm:$0xf] %vm1670_vm5, %v3244_v47  ;;  %1812 = vst.msk [vmem:[#allocation2 + $0x4] sm:$0xf] %vm1670_vm5, %v3244_v47 }
 0x201   : > { %1813 = vst.msk [vmem:[#allocation2 + $0x8] sm:$0xf] %vm1670_vm5, %v3244_v47 }
 0x202 PF: > { %p2726_p0 = scmp.ne.s32.totalorder %s3224_s21, 2 }
 0x204   : > { %1817 = sbr.rel (%p2726_p0) target bundleno = 524 (0x20c), region = 48 }
 0x209   : > { %v3245_v12 = vmov 0  }
 0x20a   : > { %1819 = vst.msk [vmem:[#allocation2 + $0x6c] sm:$0xf] %vm1670_vm5, %v3245_v12  ;;  %1820 = vst.msk [vmem:[#allocation2 + $0x70] sm:$0xf] %vm1670_vm5, %v3245_v12 }
 0x20b   : > { %1821 = vst.msk [vmem:[#allocation2 + $0x74] sm:$0xf] %vm1670_vm5, %v3245_v12 }
 0x20c PF: > { %v3118_v10 = vld [vmem:[#allocation2 + $0x68] ss:$0 sps:$4 sm:$0x11]   ;;  %v1838_v2 = vld [vmem:[#allocation2 + $0x60] sm:$0xf]  ;;  %v3246_v30 = vmov 0.0  }
 0x20d   : > { %v4039_v49 = vld [vmem:[#allocation2 + $0x64] sm:$0xf]  ;;  %2017 = vrot.lane.b32.xlu1 %v3118_v10, %s3242_s15  ;;  %v1836_v59 = vld [vmem:[#allocation2 + $0x54] sm:$0xf]  ;;  %v4047_v40 = vld [vmem:[#allocation2 + $0x58] sm:$0xf]  ;;  %2951 = vmatprep.subr.bf16.mxu0 %v3246_v30 }
 0x20e   : > { %v2735_v23 = vcombine.low %v1838_v2, %v4039_v49  ;;  %2931 = vmatprep.subr.bf16.mxu1 %v3246_v30  ;;  %s3247_s10 = smov 64   ;;  %v4054_v33 = vcombine.low %v1836_v59, %v4047_v40  ;;  %v4059_v45 = vld [vmem:[#allocation2 + $0x5c] ss:$0 sps:$4 sm:$0x11]   ;;  %v1834_v35 = vld [vmem:[#allocation2 + $0x48] sm:$0xf] }
 0x20f   : > { %v4061_v37 = vld [vmem:[#allocation2 + $0x4c] sm:$0xf]  ;;  %v4073_v11 = vld [vmem:[#allocation2 + $0x50] ss:$0 sps:$4 sm:$0x11]   ;;  %vm3248_vm14 = vmmov 0  }
 0x210   : > { %1901 = vrot.lane.b32.xlu0 %v2735_v23, %s3242_s15  ;;  %v4067_v25 = vcombine.low %v1834_v35, %v4061_v37  ;;  %v1832_v3 = vld [vmem:[#allocation2 + $0x3c] sm:$0xf]  ;;  %v1833_v38 = vld [vmem:[#allocation2 + $0x40] sm:$0xf]  ;;  %v1830_v44 = vld [vmem:[#allocation2 + $0x30] sm:$0xf]  ;;  %2947 = vmatprep.mubr.msk.bf16.mxu1 %vm3248_vm14, %v3246_v30 }
 0x211   : > { %v1840_v27 = vld [vmem:[#allocation2 + $0x6c] sm:$0xf]  ;;  %v4043_v29 = vld [vmem:[#allocation2 + $0x70] sm:$0xf]  ;;  %v4079_v36 = vcombine.low %v1832_v3, %v1833_v38  ;;  %v1831_v58 = vld [vmem:[#allocation2 + $0x34] sm:$0xf]  ;;  %2967 = vmatprep.mubr.msk.bf16.mxu0 %vm3248_vm14, %v3246_v30 }
 0x212   : > { %v3120_v56 = vld [vmem:[#allocation2 + $0x74] ss:$0 sps:$4 sm:$0x11]   ;;  %v2736_v53 = vcombine.low %v1840_v27, %v4043_v29  ;;  %v4085_v39 = vld [vmem:[#allocation2 + $0x44] ss:$0 sps:$4 sm:$0x11]   ;;  %v4091_v32 = vcombine.low %v1830_v44, %v1831_v58 }
 0x213   : > { %2036 = vrot.lane.b32.xlu1 %v3120_v56, %s3247_s10  ;;  %v4097_v7 = vld [vmem:[#allocation2 + $0x38] ss:$0 sps:$4 sm:$0x11]   ;;  %v1828_v24 = vld [vmem:[#allocation2 + $0x24] sm:$0xf]  ;;  %vm1948_vm15 = vcmask 523264  }
 0x214   : > { %1922 = vrot.lane.b32.xlu0 %v2736_v53, %s3247_s10  ;;  %v1829_v42 = vld [vmem:[#allocation2 + $0x28] sm:$0xf]  ;;  %v4109_v51 = vld [vmem:[#allocation2 + $0x2c] ss:$0 sps:$4 sm:$0x11]   ;;  %vm2160_vm0 = vcmask 785408  }
 0x215   : > { %v4103_v31 = vcombine.low %v1828_v24, %v1829_v42  ;;  %v1826_v46 = vld [vmem:[#allocation2 + $0x18] sm:$0xf]  ;;  %v1827_v61 = vld [vmem:[#allocation2 + $0x1c] sm:$0xf]  ;;  %v1824_v20 = vld [vmem:[#allocation2 + $0xc] sm:$0xf] }
 0x216   : > { %v4115_v63 = vcombine.low %v1826_v46, %v1827_v61  ;;  %v4121_v0 = vld [vmem:[#allocation2 + $0x20] ss:$0 sps:$4 sm:$0x11]   ;;  %v1825_v13 = vld [vmem:[#allocation2 + $0x10] sm:$0xf]  ;;  %s2533_s13 = sshll.u32 %s231_s9, 4  ;;  %s4383_s13 = int_to_ptr.vmem [resolvable:$true] %s2533_s13 }
 0x217   : > { %1920 = vrot.lane.b32.xlu1 %v2735_v23, %s3247_s10  ;;  %v4127_v55 = vcombine.low %v1824_v20, %v1825_v13  ;;  %v2296_v28 = vld [vmem:[#allocation2 + $0x6c] sm:$0xe]  ;;  %v4133_v57 = vld [vmem:[#allocation2 + $0x14] ss:$0 sps:$4 sm:$0x11]   ;;  %s3250_s14 = smov [#allocation3]  }
 0x218   : > { %1899 = vrot.lane.b32.xlu0 %v4054_v33, %s3242_s15  ;;  %v2295_v14 = vld [vmem:[#allocation2 + $0x60] sm:$0xe]  ;;  %v2759_v9 = vcombine.low %v2296_v28, %v4043_v29  ;;  %v2294_v4 = vld [vmem:[#allocation2 + $0x54] sm:$0xe]  ;;  %v2293_v34 = vld [vmem:[#allocation2 + $0x48] sm:$0xe] }
 0x219   : > { %v2758_v1 = vcombine.low %v2295_v14, %v4039_v49  ;;  %v4148_v5 = vcombine.low %v2294_v4, %v4047_v40  ;;  %v4154_v8 = vcombine.low %v2293_v34, %v4061_v37  ;;  %v2292_v17 = vld [vmem:[#allocation2 + $0x3c] sm:$0xe]  ;;  %v2291_v60 = vld [vmem:[#allocation2 + $0x30] sm:$0xe]  ;;  %v2290_v15 = vld [vmem:[#allocation2 + $0x24] sm:$0xe] }
 0x21a   : > { %v4160_v26 = vcombine.low %v2292_v17, %v1833_v38  ;;  %v4166_v16 = vcombine.low %v2291_v60, %v1831_v58  ;;  %v4172_v6 = vcombine.low %v2290_v15, %v1829_v42  ;;  %v2289_v54 = vld [vmem:[#allocation2 + $0x18] sm:$0xe]  ;;  %v2288_v62 = vld [vmem:[#allocation2 + $0xc] sm:$0xe]  ;;  %s3152_s8 = sshll.u32 %s3250_s14, 4  ;;  %s3153_s8 = int_to_ptr.vmem [resolvable:$false] %s3152_s8 }
 0x21b   : > { %2034 = vrot.lane.b32.xlu1 %v3118_v10, %s3247_s10  ;;  %v4178_v48 = vcombine.low %v2289_v54, %v1827_v61  ;;  %v4184_v18 = vcombine.low %v2288_v62, %v1825_v13  ;;  %v3249_v61 = vmov 0   ;;  %p3155_p5 = scmp.lt.s32.totalorder %s4383_s13, %s3153_s8 }
 0x21c   : > { %2015 = vrot.lane.b32.xlu0 %v4059_v45, %s3242_s15 }
 0x21d   : > { %3117 = vset.pattern.permute.xlu0 %v3249_v61 }
 0x21f   : > { %1918 = vrot.lane.b32.xlu1 %v4054_v33, %s3247_s10 }
 0x220   : > { %1897 = vrot.lane.b32.xlu0 %v4067_v25, %s3242_s15 }
 0x223   : > { %2032 = vrot.lane.b32.xlu1 %v4059_v45, %s3247_s10 }
 0x224   : > { %2013 = vrot.lane.b32.xlu0 %v4073_v11, %s3242_s15 }
 0x227   : > { %1916 = vrot.lane.b32.xlu1 %v4067_v25, %s3247_s10 }
 0x228   : > { %1895 = vrot.lane.b32.xlu0 %v4079_v36, %s3242_s15 }
 0x22b   : > { %2030 = vrot.lane.b32.xlu1 %v4073_v11, %s3247_s10 }
 0x22c   : > { %2011 = vrot.lane.b32.xlu0 %v4085_v39, %s3242_s15 }
 0x22f   : > { %1914 = vrot.lane.b32.xlu1 %v4079_v36, %s3247_s10 }
 0x230   : > { %1893 = vrot.lane.b32.xlu0 %v4091_v32, %s3242_s15 }
 0x233   : > { %2028 = vrot.lane.b32.xlu1 %v4085_v39, %s3247_s10 }
 0x234   : > { %2009 = vrot.lane.b32.xlu0 %v4097_v7, %s3242_s15 }
 0x237   : > { %1912 = vrot.lane.b32.xlu1 %v4091_v32, %s3247_s10 }
 0x238   : > { %1891 = vrot.lane.b32.xlu0 %v4103_v31, %s3242_s15 }
 0x23b   : > { %2026 = vrot.lane.b32.xlu1 %v4097_v7, %s3247_s10 }
 0x23c   : > { %2007 = vrot.lane.b32.xlu0 %v4109_v51, %s3242_s15 }
 0x23f   : > { %1910 = vrot.lane.b32.xlu1 %v4103_v31, %s3247_s10 }
 0x240   : > { %1889 = vrot.lane.b32.xlu0 %v4115_v63, %s3242_s15 }
 0x243   : > { %2024 = vrot.lane.b32.xlu1 %v4109_v51, %s3247_s10 }
 0x244   : > { %2005 = vrot.lane.b32.xlu0 %v4121_v0, %s3242_s15 }
 0x247   : > { %1908 = vrot.lane.b32.xlu1 %v4115_v63, %s3247_s10 }
 0x248   : > { %1887 = vrot.lane.b32.xlu0 %v4127_v55, %s3242_s15 }
 0x24b   : > { %2022 = vrot.lane.b32.xlu1 %v4121_v0, %s3247_s10 }
 0x24c   : > { %2003 = vrot.lane.b32.xlu0 %v4133_v57, %s3242_s15 }
 0x24f   : > { %2357 = vrot.lane.b32.xlu1 %v2759_v9, %s3247_s10 }
 0x250   : > { %2338 = vrot.lane.b32.xlu0 %v2758_v1, %s3242_s15 }
 0x253   : > { %2355 = vrot.lane.b32.xlu1 %v2758_v1, %s3247_s10 }
 0x254   : > { %2336 = vrot.lane.b32.xlu0 %v4148_v5, %s3242_s15 }
 0x257   : > { %2353 = vrot.lane.b32.xlu1 %v4148_v5, %s3247_s10 }
 0x258   : > { %2334 = vrot.lane.b32.xlu0 %v4154_v8, %s3242_s15 }
 0x25b   : > { %2351 = vrot.lane.b32.xlu1 %v4154_v8, %s3247_s10 }
 0x25c   : > { %2332 = vrot.lane.b32.xlu0 %v4160_v26, %s3242_s15 }
 0x25f   : > { %2349 = vrot.lane.b32.xlu1 %v4160_v26, %s3247_s10 }
 0x260   : > { %2330 = vrot.lane.b32.xlu0 %v4166_v16, %s3242_s15 }
 0x263   : > { %2347 = vrot.lane.b32.xlu1 %v4166_v16, %s3247_s10 }
 0x264   : > { %2328 = vrot.lane.b32.xlu0 %v4172_v6, %s3242_s15 }
 0x267   : > { %2345 = vrot.lane.b32.xlu1 %v4172_v6, %s3247_s10 }
 0x268   : > { %2326 = vrot.lane.b32.xlu0 %v4178_v48, %s3242_s15 }
 0x26b   : > { %2343 = vrot.lane.b32.xlu1 %v4178_v48, %s3247_s10  ;;  %s2992_s10 = smul.u32 3, %s3228_s22  ;;  %s3148_s22 = scalar_lea.vmem %s4383_s13, 32 }
 0x26c   : > { %2324 = vrot.lane.b32.xlu0 %v4184_v18, %s3242_s15  ;;  %p3149_p1 = scmp.ne.s32.totalorder %s4383_s13, %s3148_s22 }
 0x26d   : > { %s2529_s15 = sadd.s32 %s3224_s21, %s2992_s10  ;;  %s2518_s21 = scalar_lea.sflag [#allocation4], %s229_s17 }
 0x26e   : > { %s2763_s12 = sshll.u32 %s2529_s15, 5  ;;  %p3150_p2 = pnand %p3149_p1, %p3332_p3 }
 0x26f   : > { %s4381_s30 = scalar_lea.hbm %s4442_s5, %s2763_s12  ;;  %s3154_s10 = scalar_lea.vmem %s3153_s8, 64 }
 0x270   : > { %p3151_p4 = pneg %p3150_p2  ;;  %p3156_p6 = scmp.lt.s32.totalorder %s3154_s10, %s3148_s22 }
 0x272   : > { %p3157_p7 = por %p3156_p6, %p3155_p5 }
 0x274   : > { %p3158_p9 = pnand %p3157_p7, %p3151_p4 }
 0x27f   : > { %v2018_v19 = vpop.permute.xlu1 %2017 }
 0x280   : > { %v2061_v52 = vsel %vm397_vm1, %v4059_v45, %v2018_v19 }
 0x282   : > { %v1902_v43 = vpop.permute.xlu0 %1901 }
 0x283   : > { %v1947_v41 = vsel %vm397_vm1, %v4054_v33, %v1902_v43 }
 0x285   : > { %v2037_v22 = vpop.permute.xlu1 %2036 }
 0x286   : > { %v4193_v21 = vsel %vm1948_vm15, %v2061_v52, %v2037_v22  ;;  %v1923_v50 = vpop.permute.xlu0 %1922 }
 0x287   : > { %v1964_v47 = vsel %vm1948_vm15, %v1947_v41, %v1923_v50  ;;  %v2154_v12 = vshll.u32 %v4193_v21, 16 }
 0x288   : > { %v2150_v10 = vshll.u32 %v1964_v47, 16  ;;  %v2245_v2 = vsel %vm2160_vm0, %v1964_v47, 0  ;;  %v2148_v23 = vshrl.u32 %v1964_v47, 16 }
 0x289   : > { %v1921_v49 = vpop.permute.xlu1 %1920  ;;  %2952 = vmatpush3.bf16.xpose.msra.mxu0 %v2245_v2  ;;  %v2156_v53 = vrot.slane %v2154_v12, 1 }
 0x28a   : > { %v2152_v56 = vrot.slane %v2150_v10, 1  ;;  %v1900_v27 = vpop.permute.xlu0 %1899  ;;  %2953 = vmatprep.subr.bf16.mxu0 %v3246_v30 }
 0x28b   : > { %v1944_v29 = vsel %vm397_vm1, %v4067_v25, %v1900_v27  ;;  %v2509_v25 = vld [vmem:[%s4441_s4] sm:$0x3] }
 0x28c   : > { %v1962_v59 = vsel %vm1948_vm15, %v1944_v29, %v1921_v49  ;;  %v2153_v33 = vor.u32 %v2152_v56, %v2148_v23  ;;  %2512 = vperm.xlu0 %3117, %v2509_v25  }
 0x28d   : > { %v2035_v40 = vpop.permute.xlu1 %2034  ;;  %v2140_v45 = vshll.u32 %v1962_v59, 16  ;;  %v2138_v35 = vshrl.u32 %v1962_v59, 16  ;;  %v2243_v42 = vsel %vm2160_vm0, %v1962_v59, 0 }
 0x28e   : > { %v2016_v37 = vpop.permute.xlu0 %2015  ;;  %v2157_v3 = vsel %vm562_vm3, %v2153_v33, %v2156_v53 }
 0x28f   : > { %v2142_v38 = vrot.slane %v2140_v45, 1  ;;  %v2058_v44 = vsel %vm397_vm1, %v4073_v11, %v2016_v37  ;;  %v2186_v58 = vsel %vm2160_vm0, %v2157_v3, 0 }
 0x290   : > { %v4212_v24 = vsel %vm1948_vm15, %v2058_v44, %v2035_v40  ;;  %2932 = vmatpush3.bf16.xpose.msra.mxu1 %v2186_v58 }
 0x291   : > { %v1919_v46 = vpop.permute.xlu1 %1918  ;;  %v2144_v20 = vshll.u32 %v4212_v24, 16  ;;  %2954 = vmatpush3.bf16.xpose.msra.mxu0 %v2243_v42  ;;  %2933 = vmatprep.subr.bf16.mxu1 %v3246_v30  ;;  %v2143_v14 = vor.u32 %v2142_v38, %v2138_v35 }
 0x292   : > { %v1898_v11 = vpop.permute.xlu0 %1897  ;;  %2955 = vmatprep.subr.bf16.mxu0 %v3246_v30 }
 0x293   : > { %v2146_v13 = vrot.slane %v2144_v20, 1  ;;  %v1941_v28 = vsel %vm397_vm1, %v4079_v36, %v1898_v11 }
 0x294   : > { %v1960_v9 = vsel %vm1948_vm15, %v1941_v28, %v1919_v46 }
 0x295   : > { %v2033_v1 = vpop.permute.xlu1 %2032  ;;  %v2130_v4 = vshll.u32 %v1960_v9, 16  ;;  %v2147_v34 = vsel %vm562_vm3, %v2143_v14, %v2146_v13  ;;  %v2128_v15 = vshrl.u32 %v1960_v9, 16  ;;  %v2241_v36 = vsel %vm2160_vm0, %v1960_v9, 0 }
 0x296   : > { %v2014_v17 = vpop.permute.xlu0 %2013  ;;  %v2183_v60 = vsel %vm2160_vm0, %v2147_v34, 0 }
 0x297   : > { %v2132_v54 = vrot.slane %v2130_v4, 1  ;;  %v2055_v62 = vsel %vm397_vm1, %v4085_v39, %v2014_v17 }
 0x298   : > { %v4226_v19 = vsel %vm1948_vm15, %v2055_v62, %v2033_v1  ;;  %2934 = vmatpush3.bf16.xpose.msra.mxu1 %v2183_v60 }
 0x299   : > { %v1917_v52 = vpop.permute.xlu1 %1916  ;;  %v2134_v43 = vshll.u32 %v4226_v19, 16  ;;  %2956 = vmatpush3.bf16.xpose.msra.mxu0 %v2241_v36  ;;  %2935 = vmatprep.subr.bf16.mxu1 %v3246_v30  ;;  %v2133_v39 = vor.u32 %v2132_v54, %v2128_v15 }
 0x29a   : > { %v1896_v22 = vpop.permute.xlu0 %1895  ;;  %2957 = vmatprep.subr.bf16.mxu0 %v3246_v30 }
 0x29b   : > { %v2136_v41 = vrot.slane %v2134_v43, 1  ;;  %v1938_v50 = vsel %vm397_vm1, %v4091_v32, %v1896_v22 }
 0x29c   : > { %v1958_v47 = vsel %vm1948_vm15, %v1938_v50, %v1917_v52 }
 0x29d   : > { %v2031_v12 = vpop.permute.xlu1 %2030  ;;  %v2120_v10 = vshll.u32 %v1958_v47, 16  ;;  %v2137_v2 = vsel %vm562_vm3, %v2133_v39, %v2136_v41  ;;  %v2118_v56 = vshrl.u32 %v1958_v47, 16  ;;  %v2239_v32 = vsel %vm2160_vm0, %v1958_v47, 0 }
 0x29e   : > { %v2012_v49 = vpop.permute.xlu0 %2011  ;;  %v2180_v23 = vsel %vm2160_vm0, %v2137_v2, 0  ;;  %v4277_v2 = vld [vmem:[#allocation2 + $0x4] sm:$0xf] }
 0x29f   : > { %v2122_v27 = vrot.slane %v2120_v10, 1  ;;  %v2052_v29 = vsel %vm397_vm1, %v4097_v7, %v2012_v49  ;;  %v1822_v10 = vld [vmem:[#allocation2] sm:$0xf] }
 0x2a0   : > { %v4240_v53 = vsel %vm1948_vm15, %v2052_v29, %v2031_v12  ;;  %2936 = vmatpush3.bf16.xpose.msra.mxu1 %v2180_v23 }
 0x2a1   : > { %v1915_v59 = vpop.permute.xlu1 %1914  ;;  %v2124_v40 = vshll.u32 %v4240_v53, 16  ;;  %2958 = vmatpush3.bf16.xpose.msra.mxu0 %v2239_v32  ;;  %2937 = vmatprep.subr.bf16.mxu1 %v3246_v30  ;;  %v2123_v7 = vor.u32 %v2122_v27, %v2118_v56 }
 0x2a2   : > { %v1894_v33 = vpop.permute.xlu0 %1893  ;;  %2959 = vmatprep.subr.bf16.mxu0 %v3246_v30 }
 0x2a3   : > { %v2126_v45 = vrot.slane %v2124_v40, 1  ;;  %v1935_v35 = vsel %vm397_vm1, %v4103_v31, %v1894_v33 }
 0x2a4   : > { %v1956_v37 = vsel %vm1948_vm15, %v1935_v35, %v1915_v59 }
 0x2a5   : > { %v2029_v3 = vpop.permute.xlu1 %2028  ;;  %v2110_v38 = vshll.u32 %v1956_v37, 16  ;;  %v2127_v44 = vsel %vm562_vm3, %v2123_v7, %v2126_v45  ;;  %v2108_v42 = vshrl.u32 %v1956_v37, 16  ;;  %v2237_v31 = vsel %vm2160_vm0, %v1956_v37, 0 }
 0x2a6   : > { %v2010_v58 = vpop.permute.xlu0 %2009  ;;  %v2177_v25 = vsel %vm2160_vm0, %v2127_v44, 0 }
 0x2a7   : > { %v2112_v46 = vrot.slane %v2110_v38, 1  ;;  %v2049_v61 = vsel %vm397_vm1, %v4109_v51, %v2010_v58 }
 0x2a8   : > { %v4254_v20 = vsel %vm1948_vm15, %v2049_v61, %v2029_v3  ;;  %2938 = vmatpush3.bf16.xpose.msra.mxu1 %v2177_v25  ;;  %v3146_v3 = vld [vmem:[#allocation2 + $0x8] ss:$0 sps:$4 sm:$0x11]  }
 0x2a9   : > { %v1913_v11 = vpop.permute.xlu1 %1912  ;;  %v2114_v13 = vshll.u32 %v4254_v20, 16  ;;  %2960 = vmatpush3.bf16.xpose.msra.mxu0 %v2237_v31  ;;  %2939 = vmatprep.subr.bf16.mxu1 %v3246_v30  ;;  %v2113_v51 = vor.u32 %v2112_v46, %v2108_v42 }
 0x2aa   : > { %v1892_v28 = vpop.permute.xlu0 %1891  ;;  %2961 = vmatprep.subr.bf16.mxu0 %v3246_v30 }
 0x2ab   : > { %v2116_v14 = vrot.slane %v2114_v13, 1  ;;  %v1932_v9 = vsel %vm397_vm1, %v4115_v63, %v1892_v28 }
 0x2ac   : > { %v1954_v1 = vsel %vm1948_vm15, %v1932_v9, %v1913_v11 }
 0x2ad   : > { %v2027_v4 = vpop.permute.xlu1 %2026  ;;  %v2100_v34 = vshll.u32 %v1954_v1, 16  ;;  %v2117_v17 = vsel %vm562_vm3, %v2113_v51, %v2116_v14  ;;  %v2098_v54 = vshrl.u32 %v1954_v1, 16  ;;  %v2235_v63 = vsel %vm2160_vm0, %v1954_v1, 0 }
 0x2ae   : > { %v2008_v60 = vpop.permute.xlu0 %2007  ;;  %v2174_v15 = vsel %vm2160_vm0, %v2117_v17, 0 }
 0x2af   : > { %v2102_v62 = vrot.slane %v2100_v34, 1  ;;  %v2046_v36 = vsel %vm397_vm1, %v4121_v0, %v2008_v60 }
 0x2b0   : > { %v4268_v52 = vsel %vm1948_vm15, %v2046_v36, %v2027_v4  ;;  %2940 = vmatpush3.bf16.xpose.msra.mxu1 %v2174_v15 }
 0x2b1   : > { %v1911_v43 = vpop.permute.xlu1 %1910  ;;  %v2104_v22 = vshll.u32 %v4268_v52, 16  ;;  %2962 = vmatpush3.bf16.xpose.msra.mxu0 %v2235_v63  ;;  %2941 = vmatprep.subr.bf16.mxu1 %v3246_v30  ;;  %v2103_v0 = vor.u32 %v2102_v62, %v2098_v54  ;;  %v1965_v62 = vld [vmem:[%s4440_s3] sm:$0x1] }
 0x2b2   : > { %v1890_v41 = vpop.permute.xlu0 %1889  ;;  %2963 = vmatprep.subr.bf16.mxu0 %v3246_v30 }
 0x2b3   : > { %v2106_v50 = vrot.slane %v2104_v22, 1  ;;  %v1929_v39 = vsel %vm397_vm1, %v4127_v55, %v1890_v41  ;;  %v2727_v55 = vcombine.low %v1822_v10, %v4277_v2 }
 0x2b4   : > { %v1952_v47 = vsel %vm1948_vm15, %v1929_v39, %v1911_v43 }
 0x2b5   : > { %v2025_v12 = vpop.permute.xlu1 %2024  ;;  %v2090_v49 = vshll.u32 %v1952_v47, 16  ;;  %v2107_v23 = vsel %vm562_vm3, %v2103_v0, %v2106_v50  ;;  %v2088_v29 = vshrl.u32 %v1952_v47, 16  ;;  %v2233_v33 = vsel %vm2160_vm0, %v1952_v47, 0  ;;  %v2747_v47 = vld [vmem:[%s4440_s3 + $0x1] sm:$0x1] }
 0x2b6   : > { %v2006_v56 = vpop.permute.xlu0 %2005  ;;  %v2171_v27 = vsel %vm2160_vm0, %v2107_v23, 0 }
 0x2b7   : > { %v2092_v32 = vrot.slane %v2090_v49, 1  ;;  %v2043_v59 = vsel %vm397_vm1, %v4133_v57, %v2006_v56 }
 0x2b8   : > { %v4285_v40 = vsel %vm1948_vm15, %v2043_v59, %v2025_v12  ;;  %2942 = vmatpush3.bf16.xpose.msra.mxu1 %v2171_v27 }
 0x2b9   : > { %v1909_v45 = vpop.permute.xlu1 %1908  ;;  %v2094_v35 = vshll.u32 %v4285_v40, 16  ;;  %2964 = vmatpush3.bf16.xpose.msra.mxu0 %v2233_v33  ;;  %2943 = vmatprep.subr.bf16.mxu1 %v3246_v30  ;;  %v2093_v38 = vor.u32 %v2092_v32, %v2088_v29 }
 0x2ba   : > { %v1888_v7 = vpop.permute.xlu0 %1887  ;;  %2965 = vmatprep.subr.bf16.mxu0 %v3246_v30 }
 0x2bb   : > { %v2096_v37 = vrot.slane %v2094_v35, 1  ;;  %v1926_v57 = vsel %vm397_vm1, %v2727_v55, %v1888_v7  ;;  %v2287_v7 = vld [vmem:[#allocation2] sm:$0xe] }
 0x2bc   : > { %v1950_v44 = vsel %vm1948_vm15, %v1926_v57, %v1909_v45  ;;  %v2750_v57 = vcombine.low %v2287_v7, %v4277_v2  ;;  %v2428_v2 = vrot.slane %v4240_v53, 1 }
 0x2bd   : > { %v2023_v58 = vpop.permute.xlu1 %2022  ;;  %v2080_v25 = vshll.u32 %v1950_v44, 16  ;;  %v2097_v42 = vsel %vm562_vm3, %v2093_v38, %v2096_v37  ;;  %v2078_v31 = vshrl.u32 %v1950_v44, 16  ;;  %v2231_v14 = vsel %vm2160_vm0, %v1950_v44, 0 }
 0x2be   : > { %v2004_v46 = vpop.permute.xlu0 %2003  ;;  %v2168_v61 = vsel %vm2160_vm0, %v2097_v42, 0 }
 0x2bf   : > { %v2082_v11 = vrot.slane %v2080_v25, 1  ;;  %v2040_v13 = vsel %vm397_vm1, %v3146_v3, %v2004_v46 }
 0x2c0   : > { %v4297_v28 = vsel %vm1948_vm15, %v2040_v13, %v2023_v58  ;;  %2944 = vmatpush3.bf16.xpose.msra.mxu1 %v2168_v61 }
 0x2c1   : > { %v2358_v9 = vpop.permute.xlu1 %2357  ;;  %v2084_v51 = vshll.u32 %v4297_v28, 16  ;;  %2966 = vmatpush3.bf16.xpose.msra.mxu0 %v2231_v14  ;;  %2945 = vmatprep.subr.bf16.mxu1 %v3246_v30  ;;  %v2083_v17 = vor.u32 %v2082_v11, %v2078_v31 }
 0x2c2   : > { %v2339_v1 = vpop.permute.xlu0 %2338 }
 0x2c3   : > { %v2086_v4 = vrot.slane %v2084_v51, 1  ;;  %v2382_v34 = vsel %vm397_vm1, %v4148_v5, %v2339_v1  ;;  %v2437_v5 = vrot.slane %v4193_v21, 1 }
 0x2c4   : > { %v2398_v15 = vsel %vm1948_vm15, %v2382_v34, %v2358_v9 }
 0x2c5   : > { %v2356_v60 = vpop.permute.xlu1 %2355  ;;  %v2087_v54 = vsel %vm562_vm3, %v2083_v17, %v2086_v4  ;;  %v2436_v43 = vrot.slane %v2398_v15, 1  ;;  %v2422_v17 = vrot.slane %v4268_v52, 1 }
 0x2c6   : > { %v2337_v36 = vpop.permute.xlu0 %2336  ;;  %v2165_v63 = vsel %vm2160_vm0, %v2087_v54, 0 }
 0x2c7   : > { %v2379_v41 = vsel %vm397_vm1, %v4154_v8, %v2337_v36  ;;  %v2438_v39 = vsel %vm1141_vm4, %v2436_v43, %v2437_v5  ;;  %v2434_v8 = vrot.slane %v4212_v24, 1  ;;  %v2431_v24 = vrot.slane %v4226_v19, 1 }
 0x2c8   : > { %2946 = vmatpush3.bf16.xpose.msra.mxu1 %v2165_v63  ;;  %2968 = vmatmul.mubr.msk.bf16.vlgmr.msra.gmra.mxu0 %vm2160_vm0, %v1965_v62  ;;  %v2396_v12 = vsel %vm1948_vm15, %v2379_v41, %v2356_v60  ;;  %v2466_v49 = vsel %vm2160_vm0, %v2438_v39, 0  ;;  %v2416_v19 = vrot.slane %v4297_v28, 1  ;;  %v2425_v28 = vrot.slane %v4254_v20, 1  ;;  %v2760_v63 = vld [vmem:[%s4440_s3 + $0x2] sm:$0x1] }
 0x2c9   : > { %v2354_v22 = vpop.permute.xlu1 %2353  ;;  %2971 = vmatprep.subr.bf16.mxu1 %v3246_v30  ;;  %v2433_v23 = vrot.slane %v2396_v12, 1  ;;  %v2419_v62 = vrot.slane %v4285_v40, 1 }
 0x2ca   : > { %v2335_v50 = vpop.permute.xlu0 %2334 }
 0x2cb   : > { %v2376_v56 = vsel %vm397_vm1, %v4160_v26, %v2335_v50  ;;  %v2435_v29 = vsel %vm1141_vm4, %v2433_v23, %v2434_v8 }
 0x2cc   : > { %v2394_v59 = vsel %vm1948_vm15, %v2376_v56, %v2354_v22  ;;  %v2463_v33 = vsel %vm2160_vm0, %v2435_v29, 0 }
 0x2cd   : > { %v2352_v0 = vpop.permute.xlu1 %2351  ;;  %v2430_v45 = vrot.slane %v2394_v59, 1 }
 0x2ce   : > { %v2333_v10 = vpop.permute.xlu0 %2332 }
 0x2cf   : > { %2948 = vmatmul.mubr.msk.bf16.vlgmr.msra.gmra.mxu1 %vm2160_vm0, %v2747_v47  ;;  %v2373_v26 = vsel %vm397_vm1, %v4166_v16, %v2333_v10  ;;  %v2432_v3 = vsel %vm1141_vm4, %v2430_v45, %v2431_v24 }
 0x2d0   : > { %2972 = vmatpush3.bf16.xpose.msra.mxu1 %v2466_v49  ;;  %2987 = vmatprep.mubr.msk.bf16.mxu1 %vm3248_vm14, %v3246_v30  ;;  %v2392_v38 = vsel %vm1948_vm15, %v2373_v26, %v2352_v0  ;;  %v2460_v42 = vsel %vm2160_vm0, %v2432_v3, 0 }
 0x2d1   : > { %v2350_v21 = vpop.permute.xlu1 %2349  ;;  %2973 = vmatprep.subr.bf16.mxu1 %v3246_v30  ;;  %v2427_v46 = vrot.slane %v2392_v38, 1 }
 0x2d2   : > { %v2331_v27 = vpop.permute.xlu0 %2330 }
 0x2d3   : > { %v2370_v31 = vsel %vm397_vm1, %v4172_v6, %v2331_v27  ;;  %v2429_v13 = vsel %vm1141_vm4, %v2427_v46, %v2428_v2 }
 0x2d4   : > { %v2390_v14 = vsel %vm1948_vm15, %v2370_v31, %v2350_v21  ;;  %v2457_v9 = vsel %vm2160_vm0, %v2429_v13, 0 }
 0x2d5   : > { %v2348_v32 = vpop.permute.xlu1 %2347  ;;  %v2424_v51 = vrot.slane %v2390_v14, 1 }
 0x2d6   : > { %v2329_v55 = vpop.permute.xlu0 %2328 }
 0x2d7   : > { %v2367_v53 = vsel %vm397_vm1, %v4178_v48, %v2329_v55  ;;  %v2426_v1 = vsel %vm1141_vm4, %v2424_v51, %v2425_v28 }
 0x2d8   : > { %2974 = vmatpush3.bf16.xpose.msra.mxu1 %v2463_v33  ;;  %v2388_v6 = vsel %vm1948_vm15, %v2367_v53, %v2348_v32  ;;  %v2454_v4 = vsel %vm2160_vm0, %v2426_v1, 0 }
 0x2d9   : > { %v2346_v35 = vpop.permute.xlu1 %2345  ;;  %2975 = vmatprep.subr.bf16.mxu1 %v3246_v30  ;;  %v2421_v34 = vrot.slane %v2388_v6, 1 }
 0x2da   : > { %v2327_v37 = vpop.permute.xlu0 %2326 }
 0x2db   : > { %v2364_v60 = vsel %vm397_vm1, %v4184_v18, %v2327_v37  ;;  %v2423_v20 = vsel %vm1141_vm4, %v2421_v34, %v2422_v17 }
 0x2dc   : > { %v2386_v15 = vsel %vm1948_vm15, %v2364_v60, %v2346_v35  ;;  %v2451_v48 = vsel %vm2160_vm0, %v2423_v20, 0 }
 0x2dd   : > { %v2344_v44 = vpop.permute.xlu1 %2343  ;;  %v2418_v54 = vrot.slane %v2386_v15, 1 }
 0x2de   : > { %v2325_v58 = vpop.permute.xlu0 %2324 }
 0x2df   : > { %v2361_v25 = vsel %vm397_vm1, %v2750_v57, %v2325_v58  ;;  %v2420_v36 = vsel %vm1141_vm4, %v2418_v54, %v2419_v62 }
 0x2e0   : > { %v2384_v61 = vsel %vm1948_vm15, %v2361_v25, %v2344_v44  ;;  %2976 = vmatpush3.bf16.xpose.msra.mxu1 %v2460_v42  ;;  %v2448_v52 = vsel %vm2160_vm0, %v2420_v36, 0 }
 0x2e1   : > { %v2415_v16 = vrot.slane %v2384_v61, 1  ;;  %2977 = vmatprep.subr.bf16.mxu1 %v3246_v30 }
 0x2e3   : > { %v2417_v11 = vsel %vm1141_vm4, %v2415_v16, %v2416_v19 }
 0x2e4   : > { %v2445_v18 = vsel %vm2160_vm0, %v2417_v11, 0 }
 0x2e8   : > { %2978 = vmatpush3.bf16.xpose.msra.mxu1 %v2457_v9 }
 0x2e9   : > { %2979 = vmatprep.subr.bf16.mxu1 %v3246_v30 }
 0x2f0   : > { %2980 = vmatpush3.bf16.xpose.msra.mxu1 %v2454_v4 }
 0x2f1   : > { %2981 = vmatprep.subr.bf16.mxu1 %v3246_v30 }
 0x2f8   : > { %2982 = vmatpush3.bf16.xpose.msra.mxu1 %v2451_v48 }
 0x2f9   : > { %2983 = vmatprep.subr.bf16.mxu1 %v3246_v30 }
 0x300   : > { %2984 = vmatpush3.bf16.xpose.msra.mxu1 %v2448_v52 }
 0x301   : > { %2985 = vmatprep.subr.bf16.mxu1 %v3246_v30 }
 0x307   : > { %v2513_v12 = vpop.permute.xlu0 %2512 }
 0x308   : > { %2986 = vmatpush3.bf16.xpose.msra.mxu1 %v2445_v18 }
 0x30f   : > { %2988 = vmatmul.mubr.msk.bf16.vlgmr.msra.gmra.mxu1 %vm2160_vm0, %v2760_v63 }
 0x388   : > { %v2281_v40 = vpop.f32.mrf.mxu0 }
 0x38a   : > { %v2969_v43 = vpop.f32.mrf.mxu0 }
 0x38c   : > { %v2284_v22 = vpop.f32.mrf.mxu0 }
 0x38e   : > { %v2970_v5 = vpop.f32.mrf.mxu0 }
 0x38f   : > { %v2222_v41 = vpop.f32.mrf.mxu1 }
 0x390   : > { %v2282_v30 = vadd.f32 %v2281_v40, %v2222_v41 }
 0x391   : > { %v2949_v50 = vpop.f32.mrf.mxu1 }
 0x393   : > { %v2225_v39 = vpop.f32.mrf.mxu1 }
 0x395   : > { %v2950_v0 = vpop.f32.mrf.mxu1 }
 0x3cf   : > { %v2502_v47 = vpop.f32.mrf.mxu1 }
 0x3d0   : > { %v2508_v10 = vadd.f32 %v2502_v47, %v2282_v30 }
 0x3d1   : > { %v2989_v49 = vpop.f32.mrf.mxu1 }
 0x3d2   : > { %v2515_v23 = vadd.f32 %v2513_v12, %v2508_v10 }
 0x3d3   : > { %v2505_v21 = vpop.f32.mrf.mxu1 }
 0x3d4   : > { %2516 = vst [vmem:[%s231_s9] sm:$0x3] %v2515_v23 }
 0x3d5   : > { %v2990_v8 = vpop.f32.mrf.mxu1 }
 0x3d6   : > { %3161 = shalt.err (!%p3158_p9)
}
 0x3d7   : > { %s3162_s26 = scalar_lea.hbm %s4381_s30, 32  ;;  %s3166_s15 = scalar_lea.hbm %s4442_s5, 192 }
 0x3d8   : > { %p3163_p10 = scmp.ne.s32.totalorder %s4381_s30, %s3162_s26  ;;  %p3167_p13 = scmp.lt.s32.totalorder %s4381_s30, %s4442_s5 }
 0x3d9   : > { %p3168_p0 = scmp.lt.s32.totalorder %s3166_s15, %s3162_s26 }
 0x3da   : > { %p3164_p11 = pnand %p3163_p10, %p3332_p3 }
 0x3db   : > { %p3169_p1 = por %p3168_p0, %p3167_p13 }
 0x3dc   : > { %p3165_p12 = pneg %p3164_p11 }
 0x3de   : > { %p3170_p2 = pnand %p3169_p1, %p3165_p12 }
 0x3e0   : > { %3173 = shalt.err (!%p3170_p2)
}
 0x3e1   : > { %2993 = dma.vmem_to_hbm [thread:$0]  (%p3332_p3), %s4383_s13, 32, %s4381_s30, %s2518_s21  }
 0x3e2 PF: > { %p2999_p4 = scmp.ge.s32.totalorder %s3240_s25, 2  ;;  %s2545_s27 = sand.u32 1, %s3212_s18  }
 0x3e3   : > { %s2546_s22 = scalar_lea.sflag [#allocation4], %s2545_s27 }
 0x3e4   : > { %p2996_p5 = pnand %p2999_p4, %p3341_p8 }
 0x3e6   : > { %p2997_p6 = pneg %p2996_p5 }
 0x3e8   : > { %3207 = dma.done.wait (%p2997_p6), %s2546_s22, 32  }
 0x3e9   : > { %3209 = vsyncadd (%p2997_p6), %s2546_s22, 4294967264  ;;  %s18_s25 = sadd.s32 1, %s3240_s25   ;;  %s4453_s18 = smov %s3216_s19 }
 0x3ea   : > { %p15_p7 = scmp.ge.s32.totalorder %s18_s25, 8   ;;  %s4454_s19 = smov %s3220_s20 }
 0x3eb   : > { %s4455_s20 = smov %s3350_s11  ;;  %s4456_s21 = smov %s3232_s23 }
 0x3ec   : > { %s4457_s22 = smov %s3236_s24  ;;  %s4458_s23 = smov %s4461_s28 }
 0x3ed   : > { %s4459_s24 = smov %s4465_s29  ;;  %17 = sbr.rel (!%p15_p7) target bundleno = 5 (0x5), region = 89 }
 0x3f2   :  { %2551 = vsyncpa [#allocation4], 1 }
 0x3f3   :  { %2553 = vsyncpa [#allocation4 + $0x1], 1 }

</bundles_post_ra>
